<compile_context>
chip_gen: v5e
topology: v5e:2x2
jax: 0.10.0
libtpu: 0.0.40
codegen_flags: <defaults>
</compile_context>

<pallas_src>
import functools

import numpy as np
import jax
import jax.numpy as jnp
from jax.experimental import pallas as pl
from jax.experimental.pallas import tpu as pltpu


# ------------------------------ Pallas kernel -------------------------------

def _resblock_kernel(x_ref, w1_ref, s1_ref, b1_ref, w2_ref, s2_ref, b2_ref,
                     ml_ref, mr_ref, o_ref, h1_ref, *, H, W):
    """One image of the fused ResidualBlock.

    x_ref : (H*W + 4*W, C) f32  row-flattened NHWC image with 2*W zero rows of
                                top/bottom padding (the vertical conv padding).
    w*_ref: (9, C, C)      bf16 tap-major conv weights, k = dy*3 + dx.
    s*/b* : (1, C)         f32  folded BatchNorm scale / bias.
    ml/mr : (H*W, 1)       bf16 0/1 masks killing horizontal wrap for the
                                dx==0 / dx==2 taps.
    o_ref : (H*W, C)       f32  block output.
    h1_ref: (H*W + 4*W, C) f32  VMEM scratch: zero-padded conv1 activation,
                                reused as the conv2 input.
    """
    R = H * W
    P = 2 * W                      # interior offset in the padded row buffer
    C = w1_ref.shape[-1]
    mask_l = ml_ref[...]           # (R, 1) bf16
    mask_r = mr_ref[...]

    def conv3x3(src_ref, w_ref):
        acc = jnp.zeros((R, C), jnp.float32)
        for dy in range(3):
            for dx in range(3):
                off = (dy - 1) * W + (dx - 1)
                a = src_ref[pl.ds(P + off, R), :].astype(jnp.bfloat16)
                if dx == 0:        # neighbor column w-1: invalid when w == 0
                    a = a * mask_l
                elif dx == 2:      # neighbor column w+1: invalid when w == W-1
                    a = a * mask_r
                acc = acc + jnp.dot(a, w_ref[dy * 3 + dx],
                                    preferred_element_type=jnp.float32)
        return acc

    # conv1 + bn1 + relu
    h1 = jnp.maximum(conv3x3(x_ref, w1_ref) * s1_ref[...] + b1_ref[...], 0.0)

    # Stage conv1 output into the zero-padded VMEM row buffer for conv2 taps.
    h1_ref[pl.ds(0, P), :] = jnp.zeros((P, C), jnp.float32)
    h1_ref[pl.ds(P + R, P), :] = jnp.zeros((P, C), jnp.float32)
    h1_ref[pl.ds(P, R), :] = h1

    # conv2 + bn2 + identity residual + relu
    residual = x_ref[pl.ds(P, R), :]                           # f32 skip path
    out = conv3x3(h1_ref, w2_ref) * s2_ref[...] + b2_ref[...] + residual
    o_ref[...] = jnp.maximum(out, 0.0)


# ------------------------------ Python wrapper -------------------------------

def residual_block_forward(x_nchw, p1, p2):
    """ResidualBlock.forward (stride=1, downsample=None). NCHW in / NCHW out."""
    N, C, H, W = x_nchw.shape
    R, P = H * W, 2 * W
    Rp = R + 2 * P

    x = jnp.transpose(x_nchw, (0, 2, 3, 1)).astype(jnp.float32)   # NCHW->NHWC
    x_flat = x.reshape(N, R, C)
    x_pad = jnp.pad(x_flat, ((0, 0), (P, P), (0, 0)))             # vertical pad

    col = jnp.arange(R, dtype=jnp.int32) % W
    mask_l = (col > 0).astype(jnp.bfloat16).reshape(R, 1)
    mask_r = (col < W - 1).astype(jnp.bfloat16).reshape(R, 1)

    flops = 2 * 2 * N * R * 9 * C * C                 # 2 convs, 2 flops/MAC
    bytes_accessed = (x_pad.size + N * R * C + 2 * C) * 4 + 2 * 9 * C * C * 2

    kernel = functools.partial(_resblock_kernel, H=H, W=W)
    out_flat = pl.pallas_call(
        kernel,
        out_shape=jax.ShapeDtypeStruct((N, R, C), jnp.float32),
        grid_spec=pltpu.PrefetchScalarGridSpec(
            num_scalar_prefetch=0,
            grid=(N,),                                # one image per grid step
            in_specs=[
                pl.BlockSpec((None, Rp, C), lambda b: (b, 0, 0)),  # x (padded)
                pl.BlockSpec((9, C, C), lambda b: (0, 0, 0)),      # w1
                pl.BlockSpec((1, C), lambda b: (0, 0)),            # scale1
                pl.BlockSpec((1, C), lambda b: (0, 0)),            # bias1
                pl.BlockSpec((9, C, C), lambda b: (0, 0, 0)),      # w2
                pl.BlockSpec((1, C), lambda b: (0, 0)),            # scale2
                pl.BlockSpec((1, C), lambda b: (0, 0)),            # bias2
                pl.BlockSpec((R, 1), lambda b: (0, 0)),            # mask_l
                pl.BlockSpec((R, 1), lambda b: (0, 0)),            # mask_r
            ],
            out_specs=pl.BlockSpec((None, R, C), lambda b: (b, 0, 0)),
            scratch_shapes=[pltpu.VMEM((Rp, C), jnp.float32)],
        ),
        compiler_params=pltpu.CompilerParams(
            dimension_semantics=("parallel",)),
        cost_estimate=pl.CostEstimate(flops=flops, transcendentals=0,
                                      bytes_accessed=bytes_accessed),
    )(x_pad,
      p1["w"], p1["scale"].reshape(1, C), p1["bias"].reshape(1, C),
      p2["w"], p2["scale"].reshape(1, C), p2["bias"].reshape(1, C),
      mask_l, mask_r)

    out = out_flat.reshape(N, H, W, C)
    return jnp.transpose(out, (0, 3, 1, 2))                       # NHWC->NCHW


# --------------------------- parameters & reference --------------------------

def _fold_bn(gamma, beta, mean, var, eps=1e-5):
    scale = gamma / jnp.sqrt(var + eps)
    return scale, beta - mean * scale


def init_conv_bn(key, cin, cout):
    kw, kg, kb, km, kv = jax.random.split(key, 5)
    w = jax.random.normal(kw, (3, 3, cin, cout), jnp.float32) \
        * (2.0 / (9 * cin)) ** 0.5
    gamma = 1.0 + 0.1 * jax.random.normal(kg, (cout,), jnp.float32)
    beta = 0.1 * jax.random.normal(kb, (cout,), jnp.float32)
    mean = 0.1 * jax.random.normal(km, (cout,), jnp.float32)
    var = 1.0 + 0.1 * jnp.abs(jax.random.normal(kv, (cout,), jnp.float32))
    scale, bias = _fold_bn(gamma, beta, mean, var)
    # (kh, kw, Cin, Cout) -> tap-major (9, Cin, Cout), stored bf16 for the MXU.
    return {"w": w.reshape(9, cin, cout).astype(jnp.bfloat16),
            "scale": scale, "bias": bias}


def _conv3x3_ref(x_nhwc, w9):
    cin, cout = w9.shape[1], w9.shape[2]
    w_hwio = w9.astype(jnp.float32).reshape(3, 3, cin, cout)
    return jax.lax.conv_general_dilated(
        x_nhwc, w_hwio, window_strides=(1, 1), padding=((1, 1), (1, 1)),
        dimension_numbers=("NHWC", "HWIO", "NHWC"))


def reference_block(x_nchw, p1, p2):
    """Pure-JAX reference of the same forward (eval-mode BN)."""
    x = jnp.transpose(x_nchw, (0, 2, 3, 1)).astype(jnp.float32)
    h = jnp.maximum(_conv3x3_ref(x, p1["w"]) * p1["scale"] + p1["bias"], 0.0)
    o = _conv3x3_ref(h, p2["w"]) * p2["scale"] + p2["bias"] + x
    return jnp.transpose(jnp.maximum(o, 0.0), (0, 3, 1, 2))


# ----------------------------------- main ------------------------------------

if __name__ == "__main__":
    key = jax.random.PRNGKey(0)
    k1, k2, kx = jax.random.split(key, 3)

    # CIFAR-ResNet stage-3 sized block: 64 channels, 8x8 feature map, batch 2.
    N, C, H, W = 2, 64, 8, 8
    p1 = init_conv_bn(k1, C, C)        # conv1 + bn1
    p2 = init_conv_bn(k2, C, C)        # conv2 + bn2
    x = jax.random.normal(kx, (N, C, H, W), jnp.float32)

    fwd = jax.jit(lambda xx: residual_block_forward(xx, p1, p2))
    out = fwd(x)
    jax.block_until_ready(out)
    assert out.shape == (N, C, H, W) and out.dtype == jnp.float32

    ref = reference_block(x, p1, p2)
    np.testing.assert_allclose(np.asarray(out), np.asarray(ref),
                               rtol=5e-2, atol=5e-2)
    print("KERNEL_OK")
</pallas_src>

<mosaic_0001>
module attributes {stable_mosaic.version = 11 : i64} {
  func.func @_resblock_kernel(%arg0: i32, %arg1: memref<1x96x64xf32, #tpu.memory_space<vmem>>, %arg2: memref<9x64x64xbf16, #tpu.memory_space<vmem>>, %arg3: memref<1x64xf32, #tpu.memory_space<vmem>>, %arg4: memref<1x64xf32, #tpu.memory_space<vmem>>, %arg5: memref<9x64x64xbf16, #tpu.memory_space<vmem>>, %arg6: memref<1x64xf32, #tpu.memory_space<vmem>>, %arg7: memref<1x64xf32, #tpu.memory_space<vmem>>, %arg8: memref<64x1xbf16, #tpu.memory_space<vmem>>, %arg9: memref<64x1xbf16, #tpu.memory_space<vmem>>, %arg10: memref<1x64x64xf32, #tpu.memory_space<vmem>>, %arg11: memref<96x64xf32, #tpu.memory_space<vmem>>) attributes {dimension_semantics = [#tpu.dimension_semantics<parallel>], iteration_bounds = array<i64: 2>, scalar_prefetch = 0 : i64, scratch_operands = 1 : i64, tpu.core_type = #tpu.core_type<tc>, window_params = [{transform_indices = @transform_0, window_bounds = array<i64: 1, 96, 64>}, {pipeline_mode = #tpu.pipeline_mode<synchronous>, transform_indices = @transform_1, window_bounds = array<i64: 9, 64, 64>}, {pipeline_mode = #tpu.pipeline_mode<synchronous>, transform_indices = @transform_2, window_bounds = array<i64: 1, 64>}, {pipeline_mode = #tpu.pipeline_mode<synchronous>, transform_indices = @transform_3, window_bounds = array<i64: 1, 64>}, {pipeline_mode = #tpu.pipeline_mode<synchronous>, transform_indices = @transform_4, window_bounds = array<i64: 9, 64, 64>}, {pipeline_mode = #tpu.pipeline_mode<synchronous>, transform_indices = @transform_5, window_bounds = array<i64: 1, 64>}, {pipeline_mode = #tpu.pipeline_mode<synchronous>, transform_indices = @transform_6, window_bounds = array<i64: 1, 64>}, {pipeline_mode = #tpu.pipeline_mode<synchronous>, transform_indices = @transform_7, window_bounds = array<i64: 64, 1>}, {pipeline_mode = #tpu.pipeline_mode<synchronous>, transform_indices = @transform_8, window_bounds = array<i64: 64, 1>}, {transform_indices = @transform_9, window_bounds = array<i64: 1, 64, 64>}]} {
    %c0 = arith.constant 0 : index
    %c0_0 = arith.constant 0 : index
    %0 = vector.load %arg8[%c0, %c0_0] : memref<64x1xbf16, #tpu.memory_space<vmem>>, vector<64x1xbf16>
    %c0_1 = arith.constant 0 : index
    %c0_2 = arith.constant 0 : index
    %1 = vector.load %arg9[%c0_1, %c0_2] : memref<64x1xbf16, #tpu.memory_space<vmem>>, vector<64x1xbf16>
    %cst = arith.constant 0.000000e+00 : f32
    %2 = vector.broadcast %cst : f32 to vector<64x64xf32>
    %c0_3 = arith.constant 0 : index
    %c7 = arith.constant 7 : index
    %c0_4 = arith.constant 0 : index
    %3 = vector.load %arg1[%c0_3, %c7, %c0_4] : memref<1x96x64xf32, #tpu.memory_space<vmem>>, vector<1x64x64xf32>
    %4 = vector.shape_cast %3 : vector<1x64x64xf32> to vector<64x64xf32>
    %5 = arith.truncf %4 : vector<64x64xf32> to vector<64x64xbf16>
    %6 = vector.broadcast %0 : vector<64x1xbf16> to vector<64x64xbf16>
    %7 = arith.mulf %5, %6 : vector<64x64xbf16>
    %c0_5 = arith.constant 0 : index
    %c0_6 = arith.constant 0 : index
    %c0_7 = arith.constant 0 : index
    %8 = vector.load %arg2[%c0_5, %c0_6, %c0_7] : memref<9x64x64xbf16, #tpu.memory_space<vmem>>, vector<1x64x64xbf16>
    %9 = vector.shape_cast %8 : vector<1x64x64xbf16> to vector<64x64xbf16>
    %cst_8 = arith.constant dense<0.000000e+00> : vector<64x64xf32>
    %10 = tpu.matmul %7, %9, %cst_8 {dimension_numbers = #tpu.dot_dimension_numbers<[1], [0], [0], [1], [0, 0, 1, 1], [], []>} : vector<64x64xbf16>, vector<64x64xbf16>, vector<64x64xf32> -> vector<64x64xf32>
    %11 = arith.addf %2, %10 : vector<64x64xf32>
    %c0_9 = arith.constant 0 : index
    %c8 = arith.constant 8 : index
    %c0_10 = arith.constant 0 : index
    %12 = vector.load %arg1[%c0_9, %c8, %c0_10] : memref<1x96x64xf32, #tpu.memory_space<vmem>>, vector<1x64x64xf32>
    %13 = vector.shape_cast %12 : vector<1x64x64xf32> to vector<64x64xf32>
    %14 = arith.truncf %13 : vector<64x64xf32> to vector<64x64xbf16>
    %c1 = arith.constant 1 : index
    %c0_11 = arith.constant 0 : index
    %c0_12 = arith.constant 0 : index
    %15 = vector.load %arg2[%c1, %c0_11, %c0_12] : memref<9x64x64xbf16, #tpu.memory_space<vmem>>, vector<1x64x64xbf16>
    %16 = vector.shape_cast %15 : vector<1x64x64xbf16> to vector<64x64xbf16>
    %cst_13 = arith.constant dense<0.000000e+00> : vector<64x64xf32>
    %17 = tpu.matmul %14, %16, %cst_13 {dimension_numbers = #tpu.dot_dimension_numbers<[1], [0], [0], [1], [0, 0, 1, 1], [], []>} : vector<64x64xbf16>, vector<64x64xbf16>, vector<64x64xf32> -> vector<64x64xf32>
    %18 = arith.addf %11, %17 : vector<64x64xf32>
    %c0_14 = arith.constant 0 : index
    %c9 = arith.constant 9 : index
    %c0_15 = arith.constant 0 : index
    %19 = vector.load %arg1[%c0_14, %c9, %c0_15] : memref<1x96x64xf32, #tpu.memory_space<vmem>>, vector<1x64x64xf32>
    %20 = vector.shape_cast %19 : vector<1x64x64xf32> to vector<64x64xf32>
    %21 = arith.truncf %20 : vector<64x64xf32> to vector<64x64xbf16>
    %22 = vector.broadcast %1 : vector<64x1xbf16> to vector<64x64xbf16>
    %23 = arith.mulf %21, %22 : vector<64x64xbf16>
    %c2 = arith.constant 2 : index
    %c0_16 = arith.constant 0 : index
    %c0_17 = arith.constant 0 : index
    %24 = vector.load %arg2[%c2, %c0_16, %c0_17] : memref<9x64x64xbf16, #tpu.memory_space<vmem>>, vector<1x64x64xbf16>
    %25 = vector.shape_cast %24 : vector<1x64x64xbf16> to vector<64x64xbf16>
    %cst_18 = arith.constant dense<0.000000e+00> : vector<64x64xf32>
    %26 = tpu.matmul %23, %25, %cst_18 {dimension_numbers = #tpu.dot_dimension_numbers<[1], [0], [0], [1], [0, 0, 1, 1], [], []>} : vector<64x64xbf16>, vector<64x64xbf16>, vector<64x64xf32> -> vector<64x64xf32>
    %27 = arith.addf %18, %26 : vector<64x64xf32>
    %c0_19 = arith.constant 0 : index
    %c15 = arith.constant 15 : index
    %c0_20 = arith.constant 0 : index
    %28 = vector.load %arg1[%c0_19, %c15, %c0_20] : memref<1x96x64xf32, #tpu.memory_space<vmem>>, vector<1x64x64xf32>
    %29 = vector.shape_cast %28 : vector<1x64x64xf32> to vector<64x64xf32>
    %30 = arith.truncf %29 : vector<64x64xf32> to vector<64x64xbf16>
    %31 = vector.broadcast %0 : vector<64x1xbf16> to vector<64x64xbf16>
    %32 = arith.mulf %30, %31 : vector<64x64xbf16>
    %c3 = arith.constant 3 : index
    %c0_21 = arith.constant 0 : index
    %c0_22 = arith.constant 0 : index
    %33 = vector.load %arg2[%c3, %c0_21, %c0_22] : memref<9x64x64xbf16, #tpu.memory_space<vmem>>, vector<1x64x64xbf16>
    %34 = vector.shape_cast %33 : vector<1x64x64xbf16> to vector<64x64xbf16>
    %cst_23 = arith.constant dense<0.000000e+00> : vector<64x64xf32>
    %35 = tpu.matmul %32, %34, %cst_23 {dimension_numbers = #tpu.dot_dimension_numbers<[1], [0], [0], [1], [0, 0, 1, 1], [], []>} : vector<64x64xbf16>, vector<64x64xbf16>, vector<64x64xf32> -> vector<64x64xf32>
    %36 = arith.addf %27, %35 : vector<64x64xf32>
    %c0_24 = arith.constant 0 : index
    %c16 = arith.constant 16 : index
    %c0_25 = arith.constant 0 : index
    %37 = vector.load %arg1[%c0_24, %c16, %c0_25] : memref<1x96x64xf32, #tpu.memory_space<vmem>>, vector<1x64x64xf32>
    %38 = vector.shape_cast %37 : vector<1x64x64xf32> to vector<64x64xf32>
    %39 = arith.truncf %38 : vector<64x64xf32> to vector<64x64xbf16>
    %c4 = arith.constant 4 : index
    %c0_26 = arith.constant 0 : index
    %c0_27 = arith.constant 0 : index
    %40 = vector.load %arg2[%c4, %c0_26, %c0_27] : memref<9x64x64xbf16, #tpu.memory_space<vmem>>, vector<1x64x64xbf16>
    %41 = vector.shape_cast %40 : vector<1x64x64xbf16> to vector<64x64xbf16>
    %cst_28 = arith.constant dense<0.000000e+00> : vector<64x64xf32>
    %42 = tpu.matmul %39, %41, %cst_28 {dimension_numbers = #tpu.dot_dimension_numbers<[1], [0], [0], [1], [0, 0, 1, 1], [], []>} : vector<64x64xbf16>, vector<64x64xbf16>, vector<64x64xf32> -> vector<64x64xf32>
    %43 = arith.addf %36, %42 : vector<64x64xf32>
    %c0_29 = arith.constant 0 : index
    %c17 = arith.constant 17 : index
    %c0_30 = arith.constant 0 : index
    %44 = vector.load %arg1[%c0_29, %c17, %c0_30] : memref<1x96x64xf32, #tpu.memory_space<vmem>>, vector<1x64x64xf32>
    %45 = vector.shape_cast %44 : vector<1x64x64xf32> to vector<64x64xf32>
    %46 = arith.truncf %45 : vector<64x64xf32> to vector<64x64xbf16>
    %47 = vector.broadcast %1 : vector<64x1xbf16> to vector<64x64xbf16>
    %48 = arith.mulf %46, %47 : vector<64x64xbf16>
    %c5 = arith.constant 5 : index
    %c0_31 = arith.constant 0 : index
    %c0_32 = arith.constant 0 : index
    %49 = vector.load %arg2[%c5, %c0_31, %c0_32] : memref<9x64x64xbf16, #tpu.memory_space<vmem>>, vector<1x64x64xbf16>
    %50 = vector.shape_cast %49 : vector<1x64x64xbf16> to vector<64x64xbf16>
    %cst_33 = arith.constant dense<0.000000e+00> : vector<64x64xf32>
    %51 = tpu.matmul %48, %50, %cst_33 {dimension_numbers = #tpu.dot_dimension_numbers<[1], [0], [0], [1], [0, 0, 1, 1], [], []>} : vector<64x64xbf16>, vector<64x64xbf16>, vector<64x64xf32> -> vector<64x64xf32>
    %52 = arith.addf %43, %51 : vector<64x64xf32>
    %c0_34 = arith.constant 0 : index
    %c23 = arith.constant 23 : index
    %c0_35 = arith.constant 0 : index
    %53 = vector.load %arg1[%c0_34, %c23, %c0_35] : memref<1x96x64xf32, #tpu.memory_space<vmem>>, vector<1x64x64xf32>
    %54 = vector.shape_cast %53 : vector<1x64x64xf32> to vector<64x64xf32>
    %55 = arith.truncf %54 : vector<64x64xf32> to vector<64x64xbf16>
    %56 = vector.broadcast %0 : vector<64x1xbf16> to vector<64x64xbf16>
    %57 = arith.mulf %55, %56 : vector<64x64xbf16>
    %c6 = arith.constant 6 : index
    %c0_36 = arith.constant 0 : index
    %c0_37 = arith.constant 0 : index
    %58 = vector.load %arg2[%c6, %c0_36, %c0_37] : memref<9x64x64xbf16, #tpu.memory_space<vmem>>, vector<1x64x64xbf16>
    %59 = vector.shape_cast %58 : vector<1x64x64xbf16> to vector<64x64xbf16>
    %cst_38 = arith.constant dense<0.000000e+00> : vector<64x64xf32>
    %60 = tpu.matmul %57, %59, %cst_38 {dimension_numbers = #tpu.dot_dimension_numbers<[1], [0], [0], [1], [0, 0, 1, 1], [], []>} : vector<64x64xbf16>, vector<64x64xbf16>, vector<64x64xf32> -> vector<64x64xf32>
    %61 = arith.addf %52, %60 : vector<64x64xf32>
    %c0_39 = arith.constant 0 : index
    %c24 = arith.constant 24 : index
    %c0_40 = arith.constant 0 : index
    %62 = vector.load %arg1[%c0_39, %c24, %c0_40] : memref<1x96x64xf32, #tpu.memory_space<vmem>>, vector<1x64x64xf32>
    %63 = vector.shape_cast %62 : vector<1x64x64xf32> to vector<64x64xf32>
    %64 = arith.truncf %63 : vector<64x64xf32> to vector<64x64xbf16>
    %c7_41 = arith.constant 7 : index
    %c0_42 = arith.constant 0 : index
    %c0_43 = arith.constant 0 : index
    %65 = vector.load %arg2[%c7_41, %c0_42, %c0_43] : memref<9x64x64xbf16, #tpu.memory_space<vmem>>, vector<1x64x64xbf16>
    %66 = vector.shape_cast %65 : vector<1x64x64xbf16> to vector<64x64xbf16>
    %cst_44 = arith.constant dense<0.000000e+00> : vector<64x64xf32>
    %67 = tpu.matmul %64, %66, %cst_44 {dimension_numbers = #tpu.dot_dimension_numbers<[1], [0], [0], [1], [0, 0, 1, 1], [], []>} : vector<64x64xbf16>, vector<64x64xbf16>, vector<64x64xf32> -> vector<64x64xf32>
    %68 = arith.addf %61, %67 : vector<64x64xf32>
    %c0_45 = arith.constant 0 : index
    %c25 = arith.constant 25 : index
    %c0_46 = arith.constant 0 : index
    %69 = vector.load %arg1[%c0_45, %c25, %c0_46] : memref<1x96x64xf32, #tpu.memory_space<vmem>>, vector<1x64x64xf32>
    %70 = vector.shape_cast %69 : vector<1x64x64xf32> to vector<64x64xf32>
    %71 = arith.truncf %70 : vector<64x64xf32> to vector<64x64xbf16>
    %72 = vector.broadcast %1 : vector<64x1xbf16> to vector<64x64xbf16>
    %73 = arith.mulf %71, %72 : vector<64x64xbf16>
    %c8_47 = arith.constant 8 : index
    %c0_48 = arith.constant 0 : index
    %c0_49 = arith.constant 0 : index
    %74 = vector.load %arg2[%c8_47, %c0_48, %c0_49] : memref<9x64x64xbf16, #tpu.memory_space<vmem>>, vector<1x64x64xbf16>
    %75 = vector.shape_cast %74 : vector<1x64x64xbf16> to vector<64x64xbf16>
    %cst_50 = arith.constant dense<0.000000e+00> : vector<64x64xf32>
    %76 = tpu.matmul %73, %75, %cst_50 {dimension_numbers = #tpu.dot_dimension_numbers<[1], [0], [0], [1], [0, 0, 1, 1], [], []>} : vector<64x64xbf16>, vector<64x64xbf16>, vector<64x64xf32> -> vector<64x64xf32>
    %77 = arith.addf %68, %76 : vector<64x64xf32>
    %c0_51 = arith.constant 0 : index
    %c0_52 = arith.constant 0 : index
    %78 = vector.load %arg3[%c0_51, %c0_52] : memref<1x64xf32, #tpu.memory_space<vmem>>, vector<1x64xf32>
    %79 = vector.broadcast %78 : vector<1x64xf32> to vector<64x64xf32>
    %80 = arith.mulf %77, %79 : vector<64x64xf32>
    %c0_53 = arith.constant 0 : index
    %c0_54 = arith.constant 0 : index
    %81 = vector.load %arg4[%c0_53, %c0_54] : memref<1x64xf32, #tpu.memory_space<vmem>>, vector<1x64xf32>
    %82 = vector.broadcast %81 : vector<1x64xf32> to vector<64x64xf32>
    %83 = arith.addf %80, %82 : vector<64x64xf32>
    %cst_55 = arith.constant 0.000000e+00 : f32
    %84 = vector.broadcast %cst_55 : f32 to vector<64x64xf32>
    %85 = arith.maximumf %83, %84 : vector<64x64xf32>
    %cst_56 = arith.constant 0.000000e+00 : f32
    %86 = vector.broadcast %cst_56 : f32 to vector<16x64xf32>
    %c0_57 = arith.constant 0 : index
    %c0_58 = arith.constant 0 : index
    %87 = vector.load %arg11[%c0_57, %c0_58] : memref<96x64xf32, #tpu.memory_space<vmem>>, vector<16x64xf32>
    tpu.vector_store %arg11[%c0_57, %c0_58], %86 {strides = array<i32>} : memref<96x64xf32, #tpu.memory_space<vmem>>, vector<16x64xf32>,
    %cst_59 = arith.constant 0.000000e+00 : f32
    %88 = vector.broadcast %cst_59 : f32 to vector<16x64xf32>
    %c80 = arith.constant 80 : index
    %c0_60 = arith.constant 0 : index
    %89 = vector.load %arg11[%c80, %c0_60] : memref<96x64xf32, #tpu.memory_space<vmem>>, vector<16x64xf32>
    tpu.vector_store %arg11[%c80, %c0_60], %88 {strides = array<i32>} : memref<96x64xf32, #tpu.memory_space<vmem>>, vector<16x64xf32>,
    %c16_61 = arith.constant 16 : index
    %c0_62 = arith.constant 0 : index
    %90 = vector.load %arg11[%c16_61, %c0_62] : memref<96x64xf32, #tpu.memory_space<vmem>>, vector<64x64xf32>
    tpu.vector_store %arg11[%c16_61, %c0_62], %85 {strides = array<i32>} : memref<96x64xf32, #tpu.memory_space<vmem>>, vector<64x64xf32>,
    %c0_63 = arith.constant 0 : index
    %c16_64 = arith.constant 16 : index
    %c0_65 = arith.constant 0 : index
    %91 = vector.load %arg1[%c0_63, %c16_64, %c0_65] : memref<1x96x64xf32, #tpu.memory_space<vmem>>, vector<1x64x64xf32>
    %92 = vector.shape_cast %91 : vector<1x64x64xf32> to vector<64x64xf32>
    %cst_66 = arith.constant 0.000000e+00 : f32
    %93 = vector.broadcast %cst_66 : f32 to vector<64x64xf32>
    %c7_67 = arith.constant 7 : index
    %c0_68 = arith.constant 0 : index
    %94 = vector.load %arg11[%c7_67, %c0_68] : memref<96x64xf32, #tpu.memory_space<vmem>>, vector<64x64xf32>
    %95 = arith.truncf %94 : vector<64x64xf32> to vector<64x64xbf16>
    %96 = vector.broadcast %0 : vector<64x1xbf16> to vector<64x64xbf16>
    %97 = arith.mulf %95, %96 : vector<64x64xbf16>
    %c0_69 = arith.constant 0 : index
    %c0_70 = arith.constant 0 : index
    %c0_71 = arith.constant 0 : index
    %98 = vector.load %arg5[%c0_69, %c0_70, %c0_71] : memref<9x64x64xbf16, #tpu.memory_space<vmem>>, vector<1x64x64xbf16>
    %99 = vector.shape_cast %98 : vector<1x64x64xbf16> to vector<64x64xbf16>
    %cst_72 = arith.constant dense<0.000000e+00> : vector<64x64xf32>
    %100 = tpu.matmul %97, %99, %cst_72 {dimension_numbers = #tpu.dot_dimension_numbers<[1], [0], [0], [1], [0, 0, 1, 1], [], []>} : vector<64x64xbf16>, vector<64x64xbf16>, vector<64x64xf32> -> vector<64x64xf32>
    %101 = arith.addf %93, %100 : vector<64x64xf32>
    %c8_73 = arith.constant 8 : index
    %c0_74 = arith.constant 0 : index
    %102 = vector.load %arg11[%c8_73, %c0_74] : memref<96x64xf32, #tpu.memory_space<vmem>>, vector<64x64xf32>
    %103 = arith.truncf %102 : vector<64x64xf32> to vector<64x64xbf16>
    %c1_75 = arith.constant 1 : index
    %c0_76 = arith.constant 0 : index
    %c0_77 = arith.constant 0 : index
    %104 = vector.load %arg5[%c1_75, %c0_76, %c0_77] : memref<9x64x64xbf16, #tpu.memory_space<vmem>>, vector<1x64x64xbf16>
    %105 = vector.shape_cast %104 : vector<1x64x64xbf16> to vector<64x64xbf16>
    %cst_78 = arith.constant dense<0.000000e+00> : vector<64x64xf32>
    %106 = tpu.matmul %103, %105, %cst_78 {dimension_numbers = #tpu.dot_dimension_numbers<[1], [0], [0], [1], [0, 0, 1, 1], [], []>} : vector<64x64xbf16>, vector<64x64xbf16>, vector<64x64xf32> -> vector<64x64xf32>
    %107 = arith.addf %101, %106 : vector<64x64xf32>
    %c9_79 = arith.constant 9 : index
    %c0_80 = arith.constant 0 : index
    %108 = vector.load %arg11[%c9_79, %c0_80] : memref<96x64xf32, #tpu.memory_space<vmem>>, vector<64x64xf32>
    %109 = arith.truncf %108 : vector<64x64xf32> to vector<64x64xbf16>
    %110 = vector.broadcast %1 : vector<64x1xbf16> to vector<64x64xbf16>
    %111 = arith.mulf %109, %110 : vector<64x64xbf16>
    %c2_81 = arith.constant 2 : index
    %c0_82 = arith.constant 0 : index
    %c0_83 = arith.constant 0 : index
    %112 = vector.load %arg5[%c2_81, %c0_82, %c0_83] : memref<9x64x64xbf16, #tpu.memory_space<vmem>>, vector<1x64x64xbf16>
    %113 = vector.shape_cast %112 : vector<1x64x64xbf16> to vector<64x64xbf16>
    %cst_84 = arith.constant dense<0.000000e+00> : vector<64x64xf32>
    %114 = tpu.matmul %111, %113, %cst_84 {dimension_numbers = #tpu.dot_dimension_numbers<[1], [0], [0], [1], [0, 0, 1, 1], [], []>} : vector<64x64xbf16>, vector<64x64xbf16>, vector<64x64xf32> -> vector<64x64xf32>
    %115 = arith.addf %107, %114 : vector<64x64xf32>
    %c15_85 = arith.constant 15 : index
    %c0_86 = arith.constant 0 : index
    %116 = vector.load %arg11[%c15_85, %c0_86] : memref<96x64xf32, #tpu.memory_space<vmem>>, vector<64x64xf32>
    %117 = arith.truncf %116 : vector<64x64xf32> to vector<64x64xbf16>
    %118 = vector.broadcast %0 : vector<64x1xbf16> to vector<64x64xbf16>
    %119 = arith.mulf %117, %118 : vector<64x64xbf16>
    %c3_87 = arith.constant 3 : index
    %c0_88 = arith.constant 0 : index
    %c0_89 = arith.constant 0 : index
    %120 = vector.load %arg5[%c3_87, %c0_88, %c0_89] : memref<9x64x64xbf16, #tpu.memory_space<vmem>>, vector<1x64x64xbf16>
    %121 = vector.shape_cast %120 : vector<1x64x64xbf16> to vector<64x64xbf16>
    %cst_90 = arith.constant dense<0.000000e+00> : vector<64x64xf32>
    %122 = tpu.matmul %119, %121, %cst_90 {dimension_numbers = #tpu.dot_dimension_numbers<[1], [0], [0], [1], [0, 0, 1, 1], [], []>} : vector<64x64xbf16>, vector<64x64xbf16>, vector<64x64xf32> -> vector<64x64xf32>
    %123 = arith.addf %115, %122 : vector<64x64xf32>
    %c16_91 = arith.constant 16 : index
    %c0_92 = arith.constant 0 : index
    %124 = vector.load %arg11[%c16_91, %c0_92] : memref<96x64xf32, #tpu.memory_space<vmem>>, vector<64x64xf32>
    %125 = arith.truncf %124 : vector<64x64xf32> to vector<64x64xbf16>
    %c4_93 = arith.constant 4 : index
    %c0_94 = arith.constant 0 : index
    %c0_95 = arith.constant 0 : index
    %126 = vector.load %arg5[%c4_93, %c0_94, %c0_95] : memref<9x64x64xbf16, #tpu.memory_space<vmem>>, vector<1x64x64xbf16>
    %127 = vector.shape_cast %126 : vector<1x64x64xbf16> to vector<64x64xbf16>
    %cst_96 = arith.constant dense<0.000000e+00> : vector<64x64xf32>
    %128 = tpu.matmul %125, %127, %cst_96 {dimension_numbers = #tpu.dot_dimension_numbers<[1], [0], [0], [1], [0, 0, 1, 1], [], []>} : vector<64x64xbf16>, vector<64x64xbf16>, vector<64x64xf32> -> vector<64x64xf32>
    %129 = arith.addf %123, %128 : vector<64x64xf32>
    %c17_97 = arith.constant 17 : index
    %c0_98 = arith.constant 0 : index
    %130 = vector.load %arg11[%c17_97, %c0_98] : memref<96x64xf32, #tpu.memory_space<vmem>>, vector<64x64xf32>
    %131 = arith.truncf %130 : vector<64x64xf32> to vector<64x64xbf16>
    %132 = vector.broadcast %1 : vector<64x1xbf16> to vector<64x64xbf16>
    %133 = arith.mulf %131, %132 : vector<64x64xbf16>
    %c5_99 = arith.constant 5 : index
    %c0_100 = arith.constant 0 : index
    %c0_101 = arith.constant 0 : index
    %134 = vector.load %arg5[%c5_99, %c0_100, %c0_101] : memref<9x64x64xbf16, #tpu.memory_space<vmem>>, vector<1x64x64xbf16>
    %135 = vector.shape_cast %134 : vector<1x64x64xbf16> to vector<64x64xbf16>
    %cst_102 = arith.constant dense<0.000000e+00> : vector<64x64xf32>
    %136 = tpu.matmul %133, %135, %cst_102 {dimension_numbers = #tpu.dot_dimension_numbers<[1], [0], [0], [1], [0, 0, 1, 1], [], []>} : vector<64x64xbf16>, vector<64x64xbf16>, vector<64x64xf32> -> vector<64x64xf32>
    %137 = arith.addf %129, %136 : vector<64x64xf32>
    %c23_103 = arith.constant 23 : index
    %c0_104 = arith.constant 0 : index
    %138 = vector.load %arg11[%c23_103, %c0_104] : memref<96x64xf32, #tpu.memory_space<vmem>>, vector<64x64xf32>
    %139 = arith.truncf %138 : vector<64x64xf32> to vector<64x64xbf16>
    %140 = vector.broadcast %0 : vector<64x1xbf16> to vector<64x64xbf16>
    %141 = arith.mulf %139, %140 : vector<64x64xbf16>
    %c6_105 = arith.constant 6 : index
    %c0_106 = arith.constant 0 : index
    %c0_107 = arith.constant 0 : index
    %142 = vector.load %arg5[%c6_105, %c0_106, %c0_107] : memref<9x64x64xbf16, #tpu.memory_space<vmem>>, vector<1x64x64xbf16>
    %143 = vector.shape_cast %142 : vector<1x64x64xbf16> to vector<64x64xbf16>
    %cst_108 = arith.constant dense<0.000000e+00> : vector<64x64xf32>
    %144 = tpu.matmul %141, %143, %cst_108 {dimension_numbers = #tpu.dot_dimension_numbers<[1], [0], [0], [1], [0, 0, 1, 1], [], []>} : vector<64x64xbf16>, vector<64x64xbf16>, vector<64x64xf32> -> vector<64x64xf32>
    %145 = arith.addf %137, %144 : vector<64x64xf32>
    %c24_109 = arith.constant 24 : index
    %c0_110 = arith.constant 0 : index
    %146 = vector.load %arg11[%c24_109, %c0_110] : memref<96x64xf32, #tpu.memory_space<vmem>>, vector<64x64xf32>
    %147 = arith.truncf %146 : vector<64x64xf32> to vector<64x64xbf16>
    %c7_111 = arith.constant 7 : index
    %c0_112 = arith.constant 0 : index
    %c0_113 = arith.constant 0 : index
    %148 = vector.load %arg5[%c7_111, %c0_112, %c0_113] : memref<9x64x64xbf16, #tpu.memory_space<vmem>>, vector<1x64x64xbf16>
    %149 = vector.shape_cast %148 : vector<1x64x64xbf16> to vector<64x64xbf16>
    %cst_114 = arith.constant dense<0.000000e+00> : vector<64x64xf32>
    %150 = tpu.matmul %147, %149, %cst_114 {dimension_numbers = #tpu.dot_dimension_numbers<[1], [0], [0], [1], [0, 0, 1, 1], [], []>} : vector<64x64xbf16>, vector<64x64xbf16>, vector<64x64xf32> -> vector<64x64xf32>
    %151 = arith.addf %145, %150 : vector<64x64xf32>
    %c25_115 = arith.constant 25 : index
    %c0_116 = arith.constant 0 : index
    %152 = vector.load %arg11[%c25_115, %c0_116] : memref<96x64xf32, #tpu.memory_space<vmem>>, vector<64x64xf32>
    %153 = arith.truncf %152 : vector<64x64xf32> to vector<64x64xbf16>
    %154 = vector.broadcast %1 : vector<64x1xbf16> to vector<64x64xbf16>
    %155 = arith.mulf %153, %154 : vector<64x64xbf16>
    %c8_117 = arith.constant 8 : index
    %c0_118 = arith.constant 0 : index
    %c0_119 = arith.constant 0 : index
    %156 = vector.load %arg5[%c8_117, %c0_118, %c0_119] : memref<9x64x64xbf16, #tpu.memory_space<vmem>>, vector<1x64x64xbf16>
    %157 = vector.shape_cast %156 : vector<1x64x64xbf16> to vector<64x64xbf16>
    %cst_120 = arith.constant dense<0.000000e+00> : vector<64x64xf32>
    %158 = tpu.matmul %155, %157, %cst_120 {dimension_numbers = #tpu.dot_dimension_numbers<[1], [0], [0], [1], [0, 0, 1, 1], [], []>} : vector<64x64xbf16>, vector<64x64xbf16>, vector<64x64xf32> -> vector<64x64xf32>
    %159 = arith.addf %151, %158 : vector<64x64xf32>
    %c0_121 = arith.constant 0 : index
    %c0_122 = arith.constant 0 : index
    %160 = vector.load %arg6[%c0_121, %c0_122] : memref<1x64xf32, #tpu.memory_space<vmem>>, vector<1x64xf32>
    %161 = vector.broadcast %160 : vector<1x64xf32> to vector<64x64xf32>
    %162 = arith.mulf %159, %161 : vector<64x64xf32>
    %c0_123 = arith.constant 0 : index
    %c0_124 = arith.constant 0 : index
    %163 = vector.load %arg7[%c0_123, %c0_124] : memref<1x64xf32, #tpu.memory_space<vmem>>, vector<1x64xf32>
    %164 = vector.broadcast %163 : vector<1x64xf32> to vector<64x64xf32>
    %165 = arith.addf %162, %164 : vector<64x64xf32>
    %166 = arith.addf %165, %92 : vector<64x64xf32>
    %cst_125 = arith.constant 0.000000e+00 : f32
    %167 = vector.broadcast %cst_125 : f32 to vector<64x64xf32>
    %168 = arith.maximumf %166, %167 : vector<64x64xf32>
    %c0_126 = arith.constant 0 : index
    %c0_127 = arith.constant 0 : index
    %c0_128 = arith.constant 0 : index
    %169 = vector.load %arg10[%c0_126, %c0_127, %c0_128] : memref<1x64x64xf32, #tpu.memory_space<vmem>>, vector<1x64x64xf32>
    %170 = vector.shape_cast %169 : vector<1x64x64xf32> to vector<64x64xf32>
    %171 = vector.shape_cast %168 : vector<64x64xf32> to vector<1x64x64xf32>
    tpu.vector_store %arg10[%c0_126, %c0_127, %c0_128], %171 {strides = array<i32>} : memref<1x64x64xf32, #tpu.memory_space<vmem>>, vector<1x64x64xf32>,
    return
  }
  func.func @transform_0(%arg0: i32) -> (i32, i32, i32) {
    %c0_i32 = arith.constant 0 : i32
    %c0_i32_0 = arith.constant 0 : i32
    %c0_i32_1 = arith.constant 0 : i32
    return %arg0, %c0_i32, %c0_i32_0 : i32, i32, i32
  }
  func.func @transform_1(%arg0: i32) -> (i32, i32, i32) {
    %c0_i32 = arith.constant 0 : i32
    %c0_i32_0 = arith.constant 0 : i32
    %c0_i32_1 = arith.constant 0 : i32
    %c0_i32_2 = arith.constant 0 : i32
    return %c0_i32, %c0_i32_0, %c0_i32_1 : i32, i32, i32
  }
  func.func @transform_2(%arg0: i32) -> (i32, i32) {
    %c0_i32 = arith.constant 0 : i32
    %c0_i32_0 = arith.constant 0 : i32
    %c0_i32_1 = arith.constant 0 : i32
    return %c0_i32, %c0_i32_0 : i32, i32
  }
  func.func @transform_3(%arg0: i32) -> (i32, i32) {
    %c0_i32 = arith.constant 0 : i32
    %c0_i32_0 = arith.constant 0 : i32
    %c0_i32_1 = arith.constant 0 : i32
    return %c0_i32, %c0_i32_0 : i32, i32
  }
  func.func @transform_4(%arg0: i32) -> (i32, i32, i32) {
    %c0_i32 = arith.constant 0 : i32
    %c0_i32_0 = arith.constant 0 : i32
    %c0_i32_1 = arith.constant 0 : i32
    %c0_i32_2 = arith.constant 0 : i32
    return %c0_i32, %c0_i32_0, %c0_i32_1 : i32, i32, i32
  }
  func.func @transform_5(%arg0: i32) -> (i32, i32) {
    %c0_i32 = arith.constant 0 : i32
    %c0_i32_0 = arith.constant 0 : i32
    %c0_i32_1 = arith.constant 0 : i32
    return %c0_i32, %c0_i32_0 : i32, i32
  }
  func.func @transform_6(%arg0: i32) -> (i32, i32) {
    %c0_i32 = arith.constant 0 : i32
    %c0_i32_0 = arith.constant 0 : i32
    %c0_i32_1 = arith.constant 0 : i32
    return %c0_i32, %c0_i32_0 : i32, i32
  }
  func.func @transform_7(%arg0: i32) -> (i32, i32) {
    %c0_i32 = arith.constant 0 : i32
    %c0_i32_0 = arith.constant 0 : i32
    %c0_i32_1 = arith.constant 0 : i32
    return %c0_i32, %c0_i32_0 : i32, i32
  }
  func.func @transform_8(%arg0: i32) -> (i32, i32) {
    %c0_i32 = arith.constant 0 : i32
    %c0_i32_0 = arith.constant 0 : i32
    %c0_i32_1 = arith.constant 0 : i32
    return %c0_i32, %c0_i32_0 : i32, i32
  }
  func.func @transform_9(%arg0: i32) -> (i32, i32, i32) {
    %c0_i32 = arith.constant 0 : i32
    %c0_i32_0 = arith.constant 0 : i32
    %c0_i32_1 = arith.constant 0 : i32
    return %arg0, %c0_i32, %c0_i32_0 : i32, i32, i32
  }
}

</mosaic_0001>

<bundles_post_ra>
// kernel: _lambda_.1
= control target key start
LH: loop header
LB: loop body
LE: loop exit
PB: predicated region body
PF: predicated region fallthrough
CT: control target
= control target key end

     0   :  { %14 = vsyncpa [#allocation4], 0  ;;  %s4386_s0 = inlined_call_operand.vmem [shape: f32[2,96,64], index: 0, kind: input, shape index: {}]   ;;  %s4387_s1 = inlined_call_operand.hbm [shape: bf16[9,64,64], index: 1, kind: input, shape index: {}]   ;;  %s4388_s2 = inlined_call_operand.vmem [shape: f32[1,64], index: 2, kind: input, shape index: {}]   ;;  %s4389_s3 = inlined_call_operand.vmem [shape: f32[1,64], index: 3, kind: input, shape index: {}]   ;;  %s4390_s4 = inlined_call_operand.vmem [shape: bf16[9,64,64], index: 4, kind: input, shape index: {}]   ;;  %s4391_s5 = inlined_call_operand.vmem [shape: f32[1,64], index: 5, kind: input, shape index: {}]   ;;  %s4392_s6 = inlined_call_operand.vmem [shape: f32[1,64], index: 6, kind: input, shape index: {}]   ;;  %s4393_s7 = inlined_call_operand.vmem [shape: bf16[64,1], index: 7, kind: input, shape index: {}]   ;;  %s4394_s8 = inlined_call_operand.vmem [shape: bf16[64,1], index: 8, kind: input, shape index: {}]   ;;  %s4395_s9 = inlined_call_operand.hbm [shape: f32[2,64,64], index: 9, kind: output, shape index: {}]  }
   0x1   :  { %15 = vsyncpa [#allocation5], 0 }
   0x2   :  { %17 = vsyncpa [#allocation5 + $0x1], 0  ;;  %s3401_s30 = smov 0   ;;  %s3403_s10 = smov 0  }
   0x3   :  { %s3405_s11 = smov 0   ;;  %s3407_s12 = smov 0  }
   0x4 LB: > { %s3422_s13 = sadd.s32 4294967295, %s3341_s12   ;;  %s2662_s14 = sadd.s32 4294967294, %s3341_s12   ;;  %s3341_s12 = sphi %s3407_s12, %s4405_s12   ;;  %s3337_s11 = sphi %s3405_s11, %s4404_s11   ;;  %s3333_s10 = sphi %s3403_s10, %s4403_s10   ;;  %s3329_s30 = sphi %s3401_s30, %s4402_s30  }
   0x5   : > { %s3426_s15 = sadd.s32 1, %s3341_s12   ;;  %s224_s16 = sadd.s32 1, %s3337_s11 }
   0x6   : > { %s221_s17 = ssub.s32 %s3341_s12, %s3426_s15  ;;  %p234_p0 = scmp.ne.s32.totalorder %s3337_s11, %s3333_s10 }
   0x7   : > { %p222_p1 = scmp.eq.s32.totalorder %s221_s17, 0  ;;  %p235_p2 = scmp.eq.s32.totalorder %s3422_s13, 1 }
   0x8   : > { %p240_p3 = scmp.ne.s32.totalorder %s3333_s10, %s3329_s30  ;;  %p241_p4 = scmp.eq.s32.totalorder %s2662_s14, 1 }
   0x9   : > { %s3437_s18 = scalar_select %p222_p1, %s3337_s11, %s224_s16  }
   0xa   : > { %p3439_p5 = por %p235_p2, %p234_p0  ;;  %p3443_p6 = por %p241_p4, %p240_p3 }
   0xb   : > { %p2663_p7 = scmp.ge.s32.totalorder %s3341_s12, 1  ;;  %p248_p8 = scmp.lt.s32.totalorder %s3341_s12, 3 }
   0xc   : > { %p3195_p9 = scmp.eq.s32.totalorder %s3422_s13, 0  ;;  %s259_s23 = sshll.u32 %s4387_s1, 4  ;;  %s260_s23 = int_to_ptr.hbm [resolvable:$true] %s259_s23 }
   0xd   : > { %p249_p10 = pnand %p2663_p7, %p248_p8  ;;  %s3343_s24 = smov [#allocation3]  }
   0xe   : > { %s261_s25 = sshll.u32 %s3343_s24, 4  ;;  %s3344_s26 = smov 64   ;;  %s262_s25 = int_to_ptr.vmem [resolvable:$true] %s261_s25 }
   0xf   : > { %p3187_p11 = pneg %p249_p10  ;;  %s3345_s27 = smov 4  }
  0x10   : > { %306 = sbr.rel (%p249_p10) target bundleno = 728 (0x2d8), region = 56 }
  0x11   : > { %p3188_p12 = pnand %p3195_p9, %p3187_p11 }
  0x13   : > { %3190 = dma.hbm_to_vmem [thread:$0]  (!%p3188_p12), %s260_s23, 4608, %s262_s25, [#allocation4], %s3344_s26, %s3344_s26, %s3345_s27  }
  0x15   : > { %3320 = dma.done.wait (%p3195_p9), [#allocation4], 4608  }
  0x16   : > { %3322 = vsyncadd (%p3195_p9), [#allocation4], 4294962688  ;;  %v3346_v0 = vmov 0   ;;  %p343_p13 = scmp.lt.s32.totalorder %s3422_s13, 1  ;;  %v355_v1 = vld [vmem:[%s4393_s7 + $0x18] sm:$0xf] }
  0x17   : > { %3239 = vset.pattern.permute.xlu1 %v3346_v0  ;;  %3238 = vset.pattern.permute.xlu0 %v3346_v0  ;;  %v353_v2 = vld [vmem:[%s4393_s7 + $0x10] sm:$0xf]  ;;  %v3106_v3 = vld [vmem:[#allocation3 + $0x38] sm:$0xff]  ;;  %v357_v4 = vld [vmem:[%s4394_s8] sm:$0xf]  ;;  %vm534_vm0 = vcmask 523264  }
  0x18   : > { %3240 = vset.pattern.permute.xlu2 %v3346_v0  ;;  %437 = vperm.xlu1 %3239, %v355_v1   ;;  %s344_s17 = scalar_select %p343_p13, %s3422_s13, 1  ;;  %v3105_v5 = vld [vmem:[#allocation3 + $0x30] sm:$0xff]  ;;  %v356_v6 = vld [vmem:[%s4393_s7 + $0x1c] sm:$0xf]  ;;  %v3104_v8 = vld [vmem:[#allocation3 + $0x28] sm:$0xff]  ;;  %v3348_v54 = vmov 0.0  }
  0x19   : > { %419 = vperm.xlu0 %3238, %v353_v2   ;;  %659 = vperm.xlu2 %3240, %v357_v4   ;;  %v354_v7 = vld [vmem:[%s4393_s7 + $0x14] sm:$0xf]  ;;  %v358_v9 = vld [vmem:[%s4394_s8 + $0x4] sm:$0xf]  ;;  %v349_v14 = vld [vmem:[%s4393_s7] sm:$0xf] }
  0x1a   : > { %551 = vmatpush.bf16.msra.mxu0 %v3106_v3  ;;  %3172 = vmatpush.bf16.msra.mxu2 %v3106_v3  ;;  %s3180_s23 = smul.u32 96, %s344_s17  ;;  %v3103_v10 = vld [vmem:[#allocation3 + $0x20] sm:$0xff]  ;;  %v3118_v15 = vld [vmem:[#allocation3 + $0x98] sm:$0xff]  ;;  %v359_v17 = vld [vmem:[%s4394_s8 + $0x8] sm:$0xf]  ;;  %1532 = vst.msk [vmem:[#allocation2 + $0x8] sm:$0xff] %vm534_vm0, %v3348_v54 }
  0x1b   : > { %v350_v13 = vld [vmem:[%s4393_s7 + $0x4] sm:$0xf]  ;;  %v3117_v18 = vld [vmem:[#allocation3 + $0x90] sm:$0xff]  ;;  %v351_v19 = vld [vmem:[%s4393_s7 + $0x8] sm:$0xf]  ;;  %1531 = vst.msk [vmem:[#allocation2] sm:$0xff] %vm534_vm0, %v3348_v54 }
  0x1c   : > { %s3482_s17 = scalar_lea.vmem %s4386_s0, %s3180_s23  ;;  %v360_v20 = vld [vmem:[%s4394_s8 + $0xc] sm:$0xf]  ;;  %v3115_v23 = vld [vmem:[#allocation3 + $0x80] sm:$0xff]  ;;  %v362_v26 = vld [vmem:[%s4394_s8 + $0x14] sm:$0xf]  ;;  %1533 = vst.msk [vmem:[#allocation2 + $0x50] sm:$0xff] %vm534_vm0, %v3348_v54 }
  0x1d   : > { %v489_v11 = vld [vmem:[%s3482_s17 + $0x8] sm:$0xff]  ;;  %v490_v12 = vld [vmem:[%s3482_s17 + $0x10] sm:$0xff]  ;;  %v491_v24 = vld [vmem:[%s3482_s17 + $0x18] sm:$0xff]  ;;  %v3347_v46 = vmov 839922192   ;;  %1534 = vst.msk [vmem:[#allocation2 + $0x58] sm:$0xff] %vm534_vm0, %v3348_v54 }
  0x1e   : > { %552 = vmatpush.bf16.msra.mxu0 %v3105_v5  ;;  %3173 = vmatpush.bf16.msra.mxu2 %v3105_v5  ;;  %v497_v16 = vpack.c.bf16 %v490_v12, %v489_v11  ;;  %v3116_v21 = vld [vmem:[#allocation3 + $0x88] sm:$0xff]  ;;  %v492_v25 = vld [vmem:[%s3482_s17 + $0x20] sm:$0xff]  ;;  %v361_v27 = vld [vmem:[%s4394_s8 + $0x10] sm:$0xf]  ;;  %v965_v34 = vpack.c.bf16 %v491_v24, %v490_v12  ;;  %v387_v47 = vunpack.c.l.s4 %v3347_v46  ;;  %s340_s22 = sand.u32 1, %s3333_s10   ;;  %s3171_s23 = sshll.u32 %s3422_s13, 6 }
  0x1f   : > { %v352_v22 = vld [vmem:[%s4393_s7 + $0xc] sm:$0xf]  ;;  %v3513_v28 = vpack.c.bf16 %v492_v25, %v491_v24  ;;  %v363_v29 = vld [vmem:[%s4394_s8 + $0x18] sm:$0xf]  ;;  %v494_v31 = vld [vmem:[%s3482_s17 + $0x30] sm:$0xff]  ;;  %s2668_s24 = sshll.u32 %s340_s22, 6  ;;  %s2584_s28 = scalar_lea.hbm %s4395_s9, %s3171_s23 }
  0x20   : > { %446 = vperm.xlu1 %3239, %v356_v6   ;;  %v960_v30 = vld [vmem:[%s3482_s17 + $0x28] sm:$0xff]  ;;  %v364_v33 = vld [vmem:[%s4394_s8 + $0x1c] sm:$0xf]  ;;  %v496_v38 = vld [vmem:[%s3482_s17 + $0x40] sm:$0xff]  ;;  %v3543_v55 = vunpack.c.0.s8 %v387_v47  ;;  %s4291_s25 = scalar_lea.vmem [#allocation6], %s2668_s24  ;;  %s2587_s14 = sshll.u32 %s2584_s28, 4  ;;  %s2588_s14 = int_to_ptr.hbm [resolvable:$true] %s2587_s14 }
  0x21   : > { %428 = vperm.xlu0 %3238, %v354_v7   ;;  %668 = vperm.xlu2 %3240, %v358_v9   ;;  %v3522_v32 = vpack.c.bf16 %v494_v31, %v960_v30  ;;  %v966_v35 = vpack.c.bf16 %v960_v30, %v492_v25  ;;  %v962_v36 = vld [vmem:[%s3482_s17 + $0x38] sm:$0xff]  ;;  %v3101_v43 = vld [vmem:[#allocation3 + $0x10] sm:$0xff]  ;;  %v3100_v48 = vld [vmem:[#allocation3 + $0x8] sm:$0xff]  ;;  %s2585_s29 = sshll.u32 %s4291_s25, 4  ;;  %s2573_s13 = scalar_lea.sflag [#allocation5], %s340_s22  ;;  %s2586_s29 = int_to_ptr.vmem [resolvable:$true] %s2585_s29 }
  0x22   : > { %553 = vmatpush.bf16.msra.mxu0 %v3104_v8  ;;  %3174 = vmatpush.bf16.msra.mxu2 %v3104_v8  ;;  %v967_v37 = vpack.c.bf16 %v962_v36, %v494_v31  ;;  %v3533_v39 = vpack.c.bf16 %v496_v38, %v962_v36  ;;  %v3102_v40 = vld [vmem:[#allocation3 + $0x18] sm:$0xff]  ;;  %v3109_v44 = vld [vmem:[#allocation3 + $0x50] sm:$0xff]  ;;  %v3108_v49 = vld [vmem:[#allocation3 + $0x48] sm:$0xff]  ;;  %s3289_s16 = sshra.s32 %s2588_s14, 4  ;;  %s3295_s23 = scalar_lea.hbm %s4395_s9, 128  ;;  %s3290_s16 = int_to_ptr.hbm [resolvable:$true] %s3289_s16 }
  0x23   : > { %v3110_v41 = vld [vmem:[#allocation3 + $0x58] sm:$0xff]  ;;  %3176 = vmatpush.bf16.msra.mxu3 %v3102_v40  ;;  %v3133_v45 = vld [vmem:[#allocation3 + $0x110] sm:$0xff]  ;;  %616 = vmatpush.bf16.msra.mxu1 %v3102_v40  ;;  %v3132_v50 = vld [vmem:[#allocation3 + $0x108] sm:$0xff]  ;;  %s3291_s21 = scalar_lea.hbm %s3290_s16, 64  ;;  %p3296_p3 = scmp.lt.s32.totalorder %s3290_s16, %s4395_s9 }
  0x24   : > { %v3134_v42 = vld [vmem:[#allocation3 + $0x118] sm:$0xff]  ;;  %v3539_v51 = vld [vmem:[%s3482_s17 + $0x48] sm:$0xff]  ;;  %v3099_v56 = vld [vmem:[#allocation3] sm:$0xff]  ;;  %p3292_p0 = scmp.ne.s32.totalorder %s3290_s16, %s3291_s21  ;;  %p3297_p4 = scmp.lt.s32.totalorder %s3295_s23, %s3291_s21 }
  0x25   : > { %v641_v53 = vld [vmem:[%s3482_s17 + $0x9] sm:$0xff]  ;;  %v3107_v57 = vld [vmem:[#allocation3 + $0x40] sm:$0xff]  ;;  %v968_v59 = vpack.c.bf16 %v3539_v51, %v496_v38  ;;  %v642_v60 = vld [vmem:[%s3482_s17 + $0x11] sm:$0xff] }
  0x26   : > { %554 = vmatpush.bf16.msra.mxu0 %v3103_v10  ;;  %3175 = vmatpush.bf16.msra.mxu2 %v3103_v10  ;;  %v3131_v58 = vld [vmem:[#allocation3 + $0x100] sm:$0xff]  ;;  %v649_v62 = vpack.c.bf16 %v641_v53, %v641_v53  ;;  %v650_v1 = vpack.c.bf16 %v642_v60, %v642_v60  ;;  %v3114_v9 = vld [vmem:[#allocation3 + $0x78] sm:$0xff]  ;;  %v3112_v25 = vld [vmem:[#allocation3 + $0x68] sm:$0xff]  ;;  %p3293_p1 = pnand %p3292_p0, %p3439_p5  ;;  %p3298_p7 = por %p3297_p4, %p3296_p3 }
  0x27   : > { %3177 = vmatpush.bf16.msra.mxu3 %v3101_v43  ;;  %617 = vmatpush.bf16.msra.mxu1 %v3101_v43  ;;  %v1381_v63 = vld [vmem:[%s3482_s17 + $0x19] sm:$0xff]  ;;  %v1382_v0 = vld [vmem:[%s3482_s17 + $0x21] sm:$0xff]  ;;  %v366_v43 = vld [vmem:[%s3482_s17 + $0xf] sm:$0xff] }
  0x28   : > { %392 = vperm.xlu1 %3239, %v350_v13   ;;  %v1389_v2 = vpack.c.bf16 %v1381_v63, %v1381_v63  ;;  %v1390_v3 = vpack.c.bf16 %v1382_v0, %v1382_v0  ;;  %v729_v5 = vunpack.c.l.bf16 %v649_v62  ;;  %v3557_v8 = vunpack.c.l.bf16 %v650_v1  ;;  %v372_v24 = vld [vmem:[%s3482_s17 + $0x3f] sm:$0xff]  ;;  %v1383_v60 = vld [vmem:[%s3482_s17 + $0x29] sm:$0xff]  ;;  %p3294_p2 = pneg %p3293_p1 }
  0x29   : > { %383 = vperm.xlu0 %3238, %v349_v14   ;;  %2686 = vmatmul.msk.bf16.vlgmr.msra.gmra.mxu0 %vm534_vm0, %v497_v16  ;;  %v380_v31 = vpack.c.bf16 %v372_v24, %v372_v24 }
  0x2a   : > { %1018 = vmatpush.bf16.msrb.mxu0 %v3118_v15  ;;  %677 = vperm.xlu2 %3240, %v359_v17   ;;  %v3559_v10 = vunpack.c.l.bf16 %v1389_v2  ;;  %v3561_v11 = vunpack.c.l.bf16 %v1390_v3  ;;  %p3299_p8 = pnand %p3298_p7, %p3294_p2 }
  0x2b   : > { %2688 = vmatmul.msk.bf16.vlgmr.msra.gmra.mxu2 %vm534_vm0, %v3522_v32  ;;  %3178 = vmatpush.bf16.msra.mxu3 %v3100_v48 }
  0x2c   : > { %806 = vmatpush.bf16.msrb.mxu2 %v3110_v41  ;;  %618 = vmatpush.bf16.msra.mxu1 %v3100_v48  ;;  %v365_v41 = vld [vmem:[%s3482_s17 + $0x7] sm:$0xff] }
  0x2d   : > { %v3111_v48 = vld [vmem:[#allocation3 + $0x60] sm:$0xff] }
  0x2e   : > { %1019 = vmatpush.bf16.msrb.mxu0 %v3117_v18  ;;  %v3113_v18 = vld [vmem:[#allocation3 + $0x70] sm:$0xff] }
  0x2f   : > { %3179 = vmatpush.bf16.msra.mxu3 %v3099_v56 }
  0x30   : > { %401 = vperm.xlu1 %3239, %v351_v19   ;;  %807 = vmatpush.bf16.msrb.mxu2 %v3109_v44 }
  0x31   : > { %686 = vperm.xlu0 %3238, %v360_v20   ;;  %619 = vmatpush.bf16.msra.mxu1 %v3099_v56  ;;  %v374_v56 = vpack.c.bf16 %v366_v43, %v366_v43  ;;  %v367_v43 = vld [vmem:[%s3482_s17 + $0x17] sm:$0xff] }
  0x32   : > { %1020 = vmatpush.bf16.msrb.mxu0 %v3116_v21  ;;  %410 = vperm.xlu2 %3240, %v352_v22   ;;  %v369_v22 = vld [vmem:[%s3482_s17 + $0x27] sm:$0xff] }
  0x33   : > { %924 = vmatpush.bf16.msrb.mxu3 %v3114_v9  ;;  %v3614_v3 = vunpack.c.l.bf16 %v374_v56  ;;  %v1384_v9 = vld [vmem:[%s3482_s17 + $0x31] sm:$0xff] }
  0x34   : > { %808 = vmatpush.bf16.msrb.mxu2 %v3108_v49  ;;  %v3121_v49 = vld [vmem:[#allocation3 + $0xb0] sm:$0xff]  ;;  %v1392_v24 = vpack.c.bf16 %v1384_v9, %v1384_v9 }
  0x36   : > { %1021 = vmatpush.bf16.msrb.mxu0 %v3115_v23  ;;  %v371_v23 = vld [vmem:[%s3482_s17 + $0x37] sm:$0xff] }
  0x37   : > { %925 = vmatpush.bf16.msrb.mxu3 %v3113_v18  ;;  %v379_v30 = vpack.c.bf16 %v371_v23, %v371_v23 }
  0x38   : > { %704 = vperm.xlu1 %3239, %v362_v26   ;;  %809 = vmatpush.bf16.msrb.mxu2 %v3107_v57  ;;  %v370_v26 = vld [vmem:[%s3482_s17 + $0x2f] sm:$0xff] }
  0x39   : > { %695 = vperm.xlu0 %3238, %v361_v27   ;;  %2687 = vmatmul.msk.bf16.gmra.mxu0 %vm534_vm0, %v3513_v28  ;;  %v3588_v44 = vunpack.c.l.bf16 %v379_v30 }
  0x3a   : > { %713 = vperm.xlu2 %3240, %v363_v29   ;;  %1466 = vmatpush.bf16.msra.mxu0 %v3134_v42  ;;  %v377_v29 = vpack.c.bf16 %v369_v22, %v369_v22  ;;  %v3122_v42 = vld [vmem:[#allocation3 + $0xb8] sm:$0xff] }
  0x3b   : > { %2689 = vmatmul.msk.bf16.gmra.mxu2 %vm534_vm0, %v3533_v39  ;;  %926 = vmatpush.bf16.msrb.mxu3 %v3112_v25 }
  0x3c   : > { %v3584_v40 = vunpack.c.l.bf16 %v377_v29  ;;  %1136 = vmatpush.bf16.msrb.mxu1 %v3122_v42 }
  0x3e   : > { %1467 = vmatpush.bf16.msra.mxu0 %v3133_v45  ;;  %v3590_v45 = vunpack.c.l.bf16 %v380_v31 }
  0x3f   : > { %927 = vmatpush.bf16.msrb.mxu3 %v3111_v48  ;;  %v368_v48 = vld [vmem:[%s3482_s17 + $0x1f] sm:$0xff] }
  0x40   : > { %1137 = vmatpush.bf16.msrb.mxu1 %v3121_v49 }
  0x41   : > { %722 = vperm.xlu0 %3238, %v364_v33   ;;  %v378_v33 = vpack.c.bf16 %v370_v26, %v370_v26 }
  0x42   : > { %1468 = vmatpush.bf16.msra.mxu0 %v3132_v50  ;;  %v3126_v50 = vld [vmem:[#allocation3 + $0xd8] sm:$0xff] }
  0x43   : > { %v3594_v47 = vunpack.c.l.bf16 %v378_v33  ;;  %1254 = vmatpush.bf16.msra.mxu2 %v3126_v50 }
  0x46   : > { %1469 = vmatpush.bf16.msra.mxu0 %v3131_v58 }
  0x49   : > { %2766 = vmatmul.msk.bf16.vlgmr.msrb.gmra.mxu0 %vm534_vm0, %v965_v34 }
  0x59   : > { %2767 = vmatmul.msk.bf16.gmra.mxu0 %vm534_vm0, %v966_v35 }
  0x69   : > { %2768 = vmatmul.msk.bf16.gmra.mxu0 %vm534_vm0, %v967_v37 }
  0x73   : > { %v660_v52 = vpop.permute.xlu2 %659 }
  0x74   : > { %v665_v61 = vperm.slane %v660_v52, %v3543_v55  ;;  %v373_v52 = vpack.c.bf16 %v365_v41, %v365_v41 }
  0x76   : > { %v3554_v4 = vunpack.c.l.bf16 %v665_v61  ;;  %v453_v2 = vunpack.c.l.bf16 %v373_v52 }
  0x78   : > { %v745_v13 = vmul.f32 %v3554_v4, %v729_v5  ;;  %v1405_v15 = vmul.f32 %v3559_v10, %v3554_v4  ;;  %v3130_v5 = vld [vmem:[#allocation3 + $0xf8] sm:$0xff] }
  0x79   : > { %2769 = vmatmul.msk.bf16.gmra.mxu0 %vm534_vm0, %v968_v59 }
  0x7b   : > { %v669_v6 = vpop.permute.xlu2 %668 }
  0x7c   : > { %v674_v7 = vperm.slane %v669_v6, %v3543_v55  ;;  %v3120_v6 = vld [vmem:[#allocation3 + $0xa8] sm:$0xff] }
  0x7d   : > { %1138 = vmatpush.bf16.msrb.mxu1 %v3120_v6 }
  0x7e   : > { %v3563_v12 = vunpack.c.l.bf16 %v674_v7 }
  0x80   : > { %v746_v14 = vmul.f32 %v3563_v12, %v3557_v8  ;;  %v1406_v16 = vmul.f32 %v3561_v11, %v3563_v12 }
  0x82   : > { %v753_v17 = vpack.c.bf16 %v746_v14, %v745_v13  ;;  %v1413_v19 = vpack.c.bf16 %v1406_v16, %v1405_v15  ;;  %v1391_v13 = vpack.c.bf16 %v1383_v60, %v1383_v60  ;;  %v375_v60 = vpack.c.bf16 %v367_v43, %v367_v43 }
  0x84   : > { %2726 = vmatmul.msk.bf16.vlgmr.msrb.gmra.mxu2 %vm534_vm0, %v753_v17  ;;  %v678_v38 = vpop.permute.xlu2 %677  ;;  %v3674_v9 = vunpack.c.l.bf16 %v375_v60 }
  0x85   : > { %v683_v7 = vperm.slane %v678_v38, %v3543_v55  ;;  %v3125_v38 = vld [vmem:[#allocation3 + $0xd0] sm:$0xff] }
  0x86   : > { %1255 = vmatpush.bf16.msra.mxu2 %v3125_v38 }
  0x87   : > { %v3629_v25 = vunpack.c.l.bf16 %v683_v7 }
  0x89   : > { %2846 = vmatmul.msk.bf16.vlgmr.msra.gmra.mxu0 %vm534_vm0, %v1413_v19  ;;  %v3119_v19 = vld [vmem:[#allocation3 + $0xa0] sm:$0xff]  ;;  %v747_v41 = vmul.f32 %v3559_v10, %v3629_v25 }
  0x8a   : > { %v3573_v20 = vpop.permute.xlu1 %437  ;;  %1139 = vmatpush.bf16.msrb.mxu1 %v3119_v19 }
  0x8b   : > { %v420_v21 = vpop.permute.xlu0 %419  ;;  %v443_v14 = vperm.slane %v3573_v20, %v3543_v55  ;;  %v3631_v20 = vunpack.c.l.bf16 %v1391_v13 }
  0x8c   : > { %v425_v27 = vperm.slane %v420_v21, %v3543_v55  ;;  %v411_v18 = vpop.permute.xlu2 %410 }
  0x8d   : > { %v416_v21 = vperm.slane %v411_v18, %v3543_v55  ;;  %v3633_v26 = vunpack.c.l.bf16 %v443_v14  ;;  %v1407_v42 = vmul.f32 %v3631_v20, %v3629_v25  ;;  %v3129_v14 = vld [vmem:[#allocation3 + $0xf0] sm:$0xff] }
  0x8e   : > { %v3581_v36 = vunpack.c.l.bf16 %v425_v27 }
  0x8f   : > { %v3637_v30 = vunpack.c.l.bf16 %v416_v21  ;;  %v475_v52 = vmul.f32 %v3633_v26, %v3588_v44 }
  0x90   : > { %v473_v53 = vmul.f32 %v3581_v36, %v3584_v40  ;;  %v3602_v57 = vmul.f32 %v3581_v36, %v3588_v44 }
  0x92   : > { %v447_v34 = vpop.permute.xlu1 %446 }
  0x93   : > { %v429_v35 = vpop.permute.xlu0 %428  ;;  %v452_v15 = vperm.slane %v447_v34, %v3543_v55 }
  0x94   : > { %v434_v37 = vperm.slane %v429_v35, %v3543_v55 }
  0x95   : > { %v3635_v27 = vunpack.c.l.bf16 %v452_v15 }
  0x96   : > { %v3592_v46 = vunpack.c.l.bf16 %v434_v37  ;;  %v3642_v37 = vunpack.c.l.bf16 %v1392_v24 }
  0x98   : > { %v474_v54 = vmul.f32 %v3592_v46, %v3594_v47  ;;  %v3606_v58 = vmul.f32 %v3592_v46, %v3590_v45 }
  0x9a   : > { %v479_v59 = vpack.c.bf16 %v474_v54, %v473_v53  ;;  %v393_v61 = vpop.permute.xlu1 %392  ;;  %v1203_v63 = vpack.c.bf16 %v3606_v58, %v3602_v57  ;;  %v476_v53 = vmul.f32 %v3635_v27, %v3590_v45  ;;  %v3660_v54 = vmul.f32 %v3637_v30, %v3594_v47 }
  0x9b   : > { %v384_v62 = vpop.permute.xlu0 %383  ;;  %v398_v0 = vperm.slane %v393_v61, %v3543_v55  ;;  %v376_v61 = vpack.c.bf16 %v368_v48, %v368_v48 }
  0x9c   : > { %v389_v1 = vperm.slane %v384_v62, %v3543_v55  ;;  %2708 = vmatmul.msk.bf16.vlgmr.msra.gmra.mxu3 %vm534_vm0, %v479_v59 }
  0x9d   : > { %v3621_v16 = vunpack.c.l.bf16 %v398_v0  ;;  %1348 = vmatpush.bf16.msra.mxu3 %v3130_v5  ;;  %v480_v0 = vpack.c.bf16 %v476_v53, %v475_v52  ;;  %v3676_v13 = vunpack.c.l.bf16 %v376_v61  ;;  %v3123_v53 = vld [vmem:[#allocation3 + $0xc0] sm:$0xff] }
  0x9e   : > { %v3623_v17 = vunpack.c.l.bf16 %v389_v1 }
  0x9f   : > { %v470_v23 = vmul.f32 %v3621_v16, %v3614_v3  ;;  %v472_v21 = vmul.f32 %v3637_v30, %v3676_v13  ;;  %v864_v52 = vmul.f32 %v3621_v16, %v3674_v9 }
  0xa0   : > { %v469_v22 = vmul.f32 %v3623_v17, %v453_v2  ;;  %v863_v48 = vmul.f32 %v3623_v17, %v3614_v3  ;;  %v1388_v3 = vld [vmem:[%s3482_s17 + $0x51] sm:$0xff] }
  0xa1   : > { %1349 = vmatpush.bf16.msra.mxu3 %v3129_v14  ;;  %v1075_v14 = vmul.f32 %v3554_v4, %v3557_v8 }
  0xa2   : > { %v477_v29 = vpack.c.bf16 %v470_v23, %v469_v22  ;;  %v402_v31 = vpop.permute.xlu1 %401  ;;  %v1385_v22 = vld [vmem:[%s3482_s17 + $0x39] sm:$0xff]  ;;  %v1386_v23 = vld [vmem:[%s3482_s17 + $0x41] sm:$0xff]  ;;  %v871_v61 = vpack.c.bf16 %v864_v52, %v863_v48 }
  0xa3   : > { %v687_v33 = vpop.permute.xlu0 %686  ;;  %v407_v34 = vperm.slane %v402_v31, %v3543_v55  ;;  %v1393_v24 = vpack.c.bf16 %v1385_v22, %v1385_v22 }
  0xa4   : > { %v692_v35 = vperm.slane %v687_v33, %v3543_v55  ;;  %2706 = vmatmul.msk.bf16.vlgmr.msra.gmra.mxu1 %vm534_vm0, %v477_v29  ;;  %v1394_v29 = vpack.c.bf16 %v1386_v23, %v1386_v23 }
  0xa5   : > { %v3650_v49 = vunpack.c.l.bf16 %v407_v34  ;;  %v3692_v38 = vunpack.c.l.bf16 %v1393_v24 }
  0xa6   : > { %v3652_v50 = vunpack.c.l.bf16 %v692_v35  ;;  %v3124_v35 = vld [vmem:[#allocation3 + $0xc8] sm:$0xff] }
  0xa7   : > { %v3668_v62 = vmul.f32 %v3650_v49, %v3584_v40  ;;  %v471_v19 = vmul.f32 %v3650_v49, %v3674_v9  ;;  %1256 = vmatpush.bf16.msra.mxu2 %v3124_v35 }
  0xa8   : > { %v748_v56 = vmul.f32 %v3561_v11, %v3652_v50  ;;  %v1408_v59 = vmul.f32 %v3642_v37, %v3652_v50 }
  0xa9   : > { %v1202_v7 = vpack.c.bf16 %v3660_v54, %v3668_v62  ;;  %v478_v34 = vpack.c.bf16 %v472_v21, %v471_v19  ;;  %v1396_v19 = vpack.c.bf16 %v1388_v3, %v1388_v3  ;;  %v1194_v3 = vmul.f32 %v3621_v16, %v3676_v13 }
  0xaa   : > { %v754_v1 = vpack.c.bf16 %v748_v56, %v747_v41  ;;  %v1414_v2 = vpack.c.bf16 %v1408_v59, %v1407_v42  ;;  %v705_v5 = vpop.permute.xlu1 %704  ;;  %v3694_v41 = vunpack.c.l.bf16 %v1394_v29 }
  0xab   : > { %v696_v6 = vpop.permute.xlu0 %695  ;;  %v710_v15 = vperm.slane %v705_v5, %v3543_v55  ;;  %1257 = vmatpush.bf16.msra.mxu2 %v3123_v53  ;;  %v714_v5 = vpop.permute.xlu2 %713  ;;  %v1404_v29 = vunpack.c.l.bf16 %v1396_v19 }
  0xac   : > { %2709 = vmatmul.msk.bf16.gmra.mxu3 %vm534_vm0, %v480_v0  ;;  %2727 = vmatmul.msk.bf16.gmra.mxu2 %vm534_vm0, %v754_v1  ;;  %v701_v18 = vperm.slane %v696_v6, %v3543_v55  ;;  %v719_v21 = vperm.slane %v714_v5, %v3543_v55 }
  0xad   : > { %2847 = vmatmul.msk.bf16.gmra.mxu0 %vm534_vm0, %v1414_v2  ;;  %v3687_v31 = vunpack.c.l.bf16 %v710_v15  ;;  %v3128_v2 = vld [vmem:[#allocation3 + $0xe8] sm:$0xff]  ;;  %v1076_v15 = vmul.f32 %v3559_v10, %v3563_v12  ;;  %v865_v10 = vmul.f32 %v3650_v49, %v3676_v13 }
  0xae   : > { %v3689_v33 = vunpack.c.l.bf16 %v701_v18  ;;  %v1387_v18 = vld [vmem:[%s3482_s17 + $0x49] sm:$0xff]  ;;  %1350 = vmatpush.bf16.msra.mxu3 %v3128_v2  ;;  %v867_v2 = vmul.f32 %v3581_v36, %v3594_v47  ;;  %v869_v47 = vmul.f32 %v3633_v26, %v3590_v45  ;;  %v3770_v45 = vpop.f32.mrf.mxu0 }
  0xaf   : > { %v750_v43 = vmul.f32 %v3642_v37, %v3687_v31  ;;  %v1410_v59 = vmul.f32 %v3694_v41, %v3687_v31  ;;  %v1395_v22 = vpack.c.bf16 %v1387_v18, %v1387_v18  ;;  %v1083_v24 = vpack.c.bf16 %v1076_v15, %v1075_v14 }
  0xb0   : > { %v749_v42 = vmul.f32 %v3631_v20, %v3689_v33  ;;  %v1409_v56 = vmul.f32 %v3692_v38, %v3689_v33 }
  0xb1   : > { %v1403_v35 = vunpack.c.l.bf16 %v1395_v22  ;;  %v1176_v22 = vld [vmem:[%s3482_s17 + $0x4f] sm:$0xff] }
  0xb2   : > { %v755_v60 = vpack.c.bf16 %v750_v43, %v749_v42  ;;  %v1415_v1 = vpack.c.bf16 %v1410_v59, %v1409_v56  ;;  %v866_v42 = vmul.f32 %v3637_v30, %v3584_v40  ;;  %v3127_v59 = vld [vmem:[#allocation3 + $0xe0] sm:$0xff]  ;;  %v1077_v40 = vmul.f32 %v3561_v11, %v3629_v25 }
  0xb3   : > { %v723_v0 = vpop.permute.xlu0 %722  ;;  %1351 = vmatpush.bf16.msra.mxu3 %v3127_v59  ;;  %v1184_v62 = vpack.c.bf16 %v1176_v22, %v1176_v22 }
  0xb4   : > { %2707 = vmatmul.msk.bf16.gmra.mxu1 %vm534_vm0, %v478_v34  ;;  %v728_v6 = vperm.slane %v723_v0, %v3543_v55  ;;  %v3721_v34 = vunpack.c.l.bf16 %v719_v21  ;;  %v872_v53 = vpack.c.bf16 %v866_v42, %v865_v10  ;;  %v868_v0 = vmul.f32 %v3592_v46, %v3588_v44  ;;  %v566_v21 = vpop.f32.mrf.mxu2 }
  0xb5   : > { %v1080_v44 = vmul.f32 %v3692_v38, %v3687_v31 }
  0xb6   : > { %v3719_v23 = vunpack.c.l.bf16 %v728_v6  ;;  %v751_v43 = vmul.f32 %v3692_v38, %v3721_v34  ;;  %v1411_v48 = vmul.f32 %v1403_v35, %v3721_v34  ;;  %v873_v11 = vpack.c.bf16 %v868_v0, %v867_v2  ;;  %v846_v6 = vld [vmem:[%s3482_s17 + $0x47] sm:$0xff] }
  0xb7   : > { %v1081_v38 = vmul.f32 %v3694_v41, %v3721_v34 }
  0xb8   : > { %4400 = vst [vmem:[#allocation9_spill] sm:$0xff] %v3719_v23  ;;  %v752_v8 = vmul.f32 %v3694_v41, %v3719_v23  ;;  %v1412_v55 = vmul.f32 %v1404_v29, %v3719_v23  ;;  %v3781_v41 = vpop.f32.mrf.mxu0 }
  0xba   : > { %v756_v52 = vpack.c.bf16 %v752_v8, %v751_v43  ;;  %v1416_v56 = vpack.c.bf16 %v1412_v55, %v1411_v48  ;;  %v1294_v43 = vld [vmem:[%s3482_s17 + $0x50] sm:$0xff] }
  0xbc   : > { %2728 = vmatmul.msk.bf16.gmra.mxu2 %vm534_vm0, %v755_v60  ;;  %2746 = vmatmul.msk.bf16.vlgmr.msrb.gmra.mxu3 %vm534_vm0, %v871_v61  ;;  %v1078_v60 = vmul.f32 %v3631_v20, %v3652_v50  ;;  %v1079_v20 = vmul.f32 %v3642_v37, %v3689_v33  ;;  %v1082_v37 = vmul.f32 %v1403_v35, %v3719_v23  ;;  %v3779_v54 = vpop.f32.mrf.mxu2 }
  0xbd   : > { %2848 = vmatmul.msk.bf16.gmra.mxu0 %vm534_vm0, %v1415_v1  ;;  %v1193_v1 = vmul.f32 %v3623_v17, %v3674_v9  ;;  %v854_v9 = vpack.c.bf16 %v846_v6, %v846_v6 }
  0xbe   : > { %v1084_v61 = vpack.c.bf16 %v1078_v60, %v1077_v40  ;;  %v1085_v14 = vpack.c.bf16 %v1080_v44, %v1079_v20  ;;  %v1086_v19 = vpack.c.bf16 %v1082_v37, %v1081_v38  ;;  %v3142_v40 = vld [vmem:[%s4390_s4 + $0x38] sm:$0xff] }
  0xbf   : > { %v1201_v5 = vpack.c.bf16 %v1194_v3, %v1193_v1  ;;  %v862_v13 = vunpack.c.l.bf16 %v854_v9  ;;  %1656 = vmatpush.bf16.msra.mxu1 %v3142_v40  ;;  %v3150_v40 = vld [vmem:[%s4390_s4 + $0x78] sm:$0xff] }
  0xc0   : > { %v3788_v57 = vpop.f32.mrf.mxu0  ;;  %1949 = vmatpush.bf16.msrb.mxu0 %v3150_v40  ;;  %v3148_v40 = vld [vmem:[%s4390_s4 + $0x68] sm:$0xff] }
  0xc1   : > { %v870_v15 = vmul.f32 %v862_v13, %v3635_v27 }
  0xc3   : > { %v874_v18 = vpack.c.bf16 %v870_v15, %v869_v47 }
  0xc4   : > { %2786 = vmatmul.msk.bf16.vlgmr.msrb.gmra.mxu1 %vm534_vm0, %v1083_v24  ;;  %v1199_v24 = vmul.f32 %v862_v13, %v3633_v26  ;;  %v571_v35 = vpop.f32.mrf.mxu2 }
  0xc8   : > { %v3792_v58 = vpop.f32.mrf.mxu0 }
  0xcc   : > { %2729 = vmatmul.msk.bf16.gmra.mxu2 %vm534_vm0, %v756_v52  ;;  %2747 = vmatmul.msk.bf16.gmra.mxu3 %vm534_vm0, %v872_v53 }
  0xcd   : > { %2849 = vmatmul.msk.bf16.gmra.mxu0 %vm534_vm0, %v1416_v56 }
  0xd0   : > { %v3798_v55 = vpop.f32.mrf.mxu0 }
  0xd4   : > { %2787 = vmatmul.msk.bf16.gmra.mxu1 %vm534_vm0, %v1084_v61 }
  0xd8   : > { %v3807_v53 = vpop.f32.mrf.mxu0 }
  0xdc   : > { %2748 = vmatmul.msk.bf16.gmra.mxu3 %vm534_vm0, %v873_v11  ;;  %2806 = vmatmul.msk.bf16.vlgmr.msra.gmra.mxu2 %vm534_vm0, %v1201_v5  ;;  %v3141_v11 = vld [vmem:[%s4390_s4 + $0x30] sm:$0xff] }
  0xdd   : > { %1657 = vmatpush.bf16.msra.mxu1 %v3141_v11 }
  0xe0   : > { %v3816_v60 = vpop.f32.mrf.mxu0 }
  0xe4   : > { %2788 = vmatmul.msk.bf16.gmra.mxu1 %vm534_vm0, %v1085_v14  ;;  %v3140_v14 = vld [vmem:[%s4390_s4 + $0x28] sm:$0xff] }
  0xe5   : > { %1658 = vmatpush.bf16.msra.mxu1 %v3140_v14 }
  0xe8   : > { %v3822_v1 = vpop.f32.mrf.mxu0 }
  0xec   : > { %2749 = vmatmul.msk.bf16.gmra.mxu3 %vm534_vm0, %v874_v18  ;;  %2807 = vmatmul.msk.bf16.gmra.mxu2 %vm534_vm0, %v1202_v7  ;;  %v1192_v7 = vunpack.c.l.bf16 %v1184_v62 }
  0xee   : > { %v1200_v29 = vmul.f32 %v1192_v7, %v3635_v27  ;;  %v3139_v7 = vld [vmem:[%s4390_s4 + $0x20] sm:$0xff] }
  0xef   : > { %1659 = vmatpush.bf16.msra.mxu1 %v3139_v7 }
  0xf0   : > { %v1204_v8 = vpack.c.bf16 %v1200_v29, %v1199_v24  ;;  %v3829_v6 = vpop.f32.mrf.mxu0  ;;  %v3138_v24 = vld [vmem:[%s4390_s4 + $0x18] sm:$0xff] }
  0xf1   : > { %1721 = vmatpush.bf16.msrb.mxu2 %v3138_v24  ;;  %v3135_v24 = vld [vmem:[%s4390_s4] sm:$0xff] }
  0xf4   : > { %2789 = vmatmul.msk.bf16.gmra.mxu1 %vm534_vm0, %v1086_v19 }
  0xf8   : > { %v3838_v13 = vpop.f32.mrf.mxu0 }
  0xfc   : > { %2808 = vmatmul.msk.bf16.gmra.mxu2 %vm534_vm0, %v1203_v63  ;;  %2826 = vmatmul.msk.bf16.vlgmr.msra.gmra.mxu3 %vm534_vm0, %v3513_v28  ;;  %v3790_v28 = vpop.f32.mrf.mxu2 }
 0x100   : > { %v3844_v37 = vpop.f32.mrf.mxu0 }
 0x107   : > { %v811_v63 = vpop.f32.mrf.mxu2 }
 0x108   : > { %v3852_v62 = vpop.f32.mrf.mxu0 }
 0x10c   : > { %2809 = vmatmul.msk.bf16.gmra.mxu2 %vm534_vm0, %v1204_v8  ;;  %2827 = vmatmul.msk.bf16.gmra.mxu3 %vm534_vm0, %v3522_v32  ;;  %v1298_v32 = vpack.c.bf16 %v1294_v43, %v3539_v51 }
 0x10f   : > { %v3801_v48 = vpop.f32.mrf.mxu2 }
 0x11c   : > { %2828 = vmatmul.msk.bf16.gmra.mxu3 %vm534_vm0, %v3533_v39 }
 0x11f   : > { %v631_v10 = vpop.f32.mrf.mxu3 }
 0x120   : > { %v3796_v42 = vadd.f32 %v631_v10, %v566_v21  ;;  %v3137_v10 = vld [vmem:[%s4390_s4 + $0x10] sm:$0xff] }
 0x121   : > { %v621_v3 = vpop.f32.mrf.mxu1  ;;  %1722 = vmatpush.bf16.msrb.mxu2 %v3137_v10  ;;  %v3149_v10 = vld [vmem:[%s4390_s4 + $0x70] sm:$0xff] }
 0x122   : > { %v622_v8 = vadd.f32 %v621_v3, %v3770_v45  ;;  %v3136_v45 = vld [vmem:[%s4390_s4 + $0x8] sm:$0xff]  ;;  %v1471_v3 = vpop.f32.mrf.mxu0  ;;  %1950 = vmatpush.bf16.msrb.mxu0 %v3149_v10 }
 0x125   : > { %1723 = vmatpush.bf16.msrb.mxu2 %v3136_v45 }
 0x126   : > { %1951 = vmatpush.bf16.msrb.mxu0 %v3148_v40 }
 0x127   : > { %v3803_v52 = vpop.f32.mrf.mxu3 }
 0x129   : > { %v623_v20 = vpop.f32.mrf.mxu1  ;;  %1724 = vmatpush.bf16.msrb.mxu2 %v3135_v24  ;;  %v3147_v24 = vld [vmem:[%s4390_s4 + $0x60] sm:$0xff] }
 0x12a   : > { %v624_v14 = vadd.f32 %v623_v20, %v3781_v41  ;;  %v3154_v20 = vld [vmem:[%s4390_s4 + $0x98] sm:$0xff]  ;;  %1952 = vmatpush.bf16.msrb.mxu0 %v3147_v24 }
 0x12b   : > { %2043 = vmatpush.bf16.msrb.mxu1 %v3154_v20 }
 0x12c   : > { %2829 = vmatmul.msk.bf16.gmra.mxu3 %vm534_vm0, %v1298_v32  ;;  %v831_v32 = vadd.f32 %v811_v63, %v622_v8  ;;  %v3145_v8 = vld [vmem:[%s4390_s4 + $0x50] sm:$0xff]  ;;  %v832_v41 = vadd.f32 %v3801_v48, %v624_v14  ;;  %v3143_v14 = vld [vmem:[%s4390_s4 + $0x40] sm:$0xff] }
 0x12f   : > { %v636_v56 = vpop.f32.mrf.mxu3  ;;  %v3811_v39 = vpop.f32.mrf.mxu2 }
 0x130   : > { %v3809_v59 = vadd.f32 %v636_v56, %v571_v35  ;;  %v3146_v56 = vld [vmem:[%s4390_s4 + $0x58] sm:$0xff] }
 0x131   : > { %v626_v15 = vpop.f32.mrf.mxu1  ;;  %1831 = vmatpush.bf16.msrb.mxu3 %v3146_v56  ;;  %v3144_v56 = vld [vmem:[%s4390_s4 + $0x48] sm:$0xff] }
 0x132   : > { %v627_v48 = vadd.f32 %v626_v15, %v3788_v57 }
 0x134   : > { %v833_v57 = vadd.f32 %v3811_v39, %v627_v48 }
 0x135   : > { %1832 = vmatpush.bf16.msrb.mxu3 %v3145_v8 }
 0x137   : > { %v3818_v61 = vpop.f32.mrf.mxu3  ;;  %v3820_v0 = vpop.f32.mrf.mxu2 }
 0x139   : > { %v628_v19 = vpop.f32.mrf.mxu1  ;;  %1833 = vmatpush.bf16.msrb.mxu3 %v3144_v56 }
 0x13a   : > { %v629_v56 = vadd.f32 %v628_v19, %v3792_v58  ;;  %v3153_v58 = vld [vmem:[%s4390_s4 + $0x90] sm:$0xff]  ;;  %v1551_v19 = vld [vmem:[#allocation2 + $0x7] sm:$0xff] }
 0x13b   : > { %2044 = vmatpush.bf16.msrb.mxu1 %v3153_v58 }
 0x13c   : > { %v834_v24 = vadd.f32 %v3820_v0, %v629_v56  ;;  %v1559_v0 = vpack.c.bf16 %v1551_v19, %v1551_v19 }
 0x13d   : > { %1834 = vmatpush.bf16.msrb.mxu3 %v3143_v14 }
 0x13f   : > { %v929_v51 = vpop.f32.mrf.mxu3  ;;  %v3824_v2 = vpop.f32.mrf.mxu2 }
 0x140   : > { %v949_v11 = vadd.f32 %v929_v51, %v831_v32 }
 0x141   : > { %v1141_v29 = vpop.f32.mrf.mxu1 }
 0x142   : > { %v1043_v32 = vadd.f32 %v3798_v55, %v949_v11  ;;  %v1473_v55 = vpop.f32.mrf.mxu0 }
 0x144   : > { %v1161_v45 = vadd.f32 %v1141_v29, %v1043_v32 }
 0x147   : > { %v931_v5 = vpop.f32.mrf.mxu3  ;;  %v3831_v44 = vpop.f32.mrf.mxu2 }
 0x148   : > { %v950_v23 = vadd.f32 %v931_v5, %v832_v41  ;;  %v3909_v41 = vld [vmem:[%s4388_s2] ss:$0 sm:$0xff] }
 0x149   : > { %v1143_v63 = vpop.f32.mrf.mxu1 }
 0x14a   : > { %v1044_v10 = vadd.f32 %v3807_v53, %v950_v23 }
 0x14c   : > { %v1162_v20 = vadd.f32 %v1143_v63, %v1044_v10 }
 0x14f   : > { %v3833_v9 = vpop.f32.mrf.mxu3  ;;  %v3842_v18 = vpop.f32.mrf.mxu2 }
 0x150   : > { %v951_v23 = vadd.f32 %v3833_v9, %v833_v57 }
 0x151   : > { %v1146_v29 = vpop.f32.mrf.mxu1 }
 0x152   : > { %v1045_v39 = vadd.f32 %v3816_v60, %v951_v23 }
 0x154   : > { %v1163_v63 = vadd.f32 %v1146_v29, %v1045_v39  ;;  %v1567_v39 = vunpack.c.l.bf16 %v1559_v0 }
 0x157   : > { %v3840_v47 = vpop.f32.mrf.mxu3  ;;  %v3848_v21 = vpop.f32.mrf.mxu2 }
 0x15f   : > { %v3846_v38 = vpop.f32.mrf.mxu3  ;;  %v1259_v35 = vpop.f32.mrf.mxu2 }
 0x160   : > { %v1279_v11 = vadd.f32 %v1259_v35, %v1161_v45  ;;  %v3915_v35 = vld [vmem:[%s4389_s3] ss:$0 sm:$0xff] }
 0x167   : > { %v3850_v22 = vpop.f32.mrf.mxu3  ;;  %v1261_v7 = vpop.f32.mrf.mxu2 }
 0x168   : > { %v1280_v40 = vadd.f32 %v1261_v7, %v1162_v20  ;;  %v952_v7 = vadd.f32 %v3840_v47, %v834_v24  ;;  %v1595_v20 = vld [vmem:[#allocation2 + $0x8] sm:$0xff] }
 0x16a   : > { %v1046_v23 = vadd.f32 %v3822_v1, %v952_v7 }
 0x16f   : > { %v3864_v43 = vpop.f32.mrf.mxu3  ;;  %v1264_v5 = vpop.f32.mrf.mxu2 }
 0x170   : > { %v1281_v60 = vadd.f32 %v1264_v5, %v1163_v63 }
 0x177   : > { %v3885_v51 = vpop.f32.mrf.mxu3 }
 0x17f   : > { %v1353_v8 = vpop.f32.mrf.mxu3 }
 0x180   : > { %v1373_v32 = vadd.f32 %v1353_v8, %v1279_v11  ;;  %v1476_v11 = vpop.f32.mrf.mxu0  ;;  %v1148_v8 = vpop.f32.mrf.mxu1 }
 0x181   : > { %v1164_v1 = vadd.f32 %v1148_v8, %v1046_v23 }
 0x182   : > { %v1491_v15 = vadd.f32 %v1471_v3, %v1373_v32  ;;  %v1266_v32 = vpop.f32.mrf.mxu2 }
 0x183   : > { %v1282_v19 = vadd.f32 %v1266_v32, %v1164_v1 }
 0x184   : > { %v1503_v53 = vmul.f32 %v3909_v41, %v1491_v15 }
 0x186   : > { %v1515_v45 = vadd.f32 %v3915_v35, %v1503_v53 }
 0x187   : > { %v1355_v14 = vpop.f32.mrf.mxu3 }
 0x188   : > { %v1523_v3 = vmax.f32 %v1515_v45, 0.0  ;;  %v1374_v48 = vadd.f32 %v1355_v14, %v1280_v40  ;;  %v1478_v56 = vpop.f32.mrf.mxu0  ;;  %v835_v40 = vadd.f32 %v3824_v2, %v3796_v42  ;;  %v1151_v24 = vpop.f32.mrf.mxu1 }
 0x18a   : > { %1535 = vst.msk [vmem:[#allocation2 + $0x10] sm:$0xff] %vm534_vm0, %v1523_v3  ;;  %v1492_v9 = vadd.f32 %v1473_v55, %v1374_v48  ;;  %v953_v48 = vadd.f32 %v3846_v38, %v835_v40 }
 0x18c   : > { %v1504_v10 = vmul.f32 %v3909_v41, %v1492_v9  ;;  %v1269_v9 = vpop.f32.mrf.mxu2  ;;  %v1047_v38 = vadd.f32 %v3829_v6, %v953_v48 }
 0x18e   : > { %v1516_v57 = vadd.f32 %v3915_v35, %v1504_v10  ;;  %v634_v10 = vadd.f32 %v3803_v52, %v3779_v54  ;;  %v3152_v54 = vld [vmem:[%s4390_s4 + $0x88] sm:$0xff]  ;;  %v1165_v6 = vadd.f32 %v1151_v24, %v1047_v38 }
 0x18f   : > { %v1358_v15 = vpop.f32.mrf.mxu3  ;;  %2045 = vmatpush.bf16.msrb.mxu1 %v3152_v54 }
 0x190   : > { %v1524_v55 = vmax.f32 %v1516_v57, 0.0  ;;  %v1375_v53 = vadd.f32 %v1358_v15, %v1281_v60  ;;  %v836_v15 = vadd.f32 %v3831_v44, %v634_v10  ;;  %v1481_v52 = vpop.f32.mrf.mxu0 }
 0x191   : > { %v3933_v29 = vld [vmem:[#allocation2 + $0x10] sm:$0xff] }
 0x192   : > { %v1552_v47 = vld [vmem:[#allocation2 + $0xf] sm:$0xff]  ;;  %1536 = vst.msk [vmem:[#allocation2 + $0x18] sm:$0xff] %vm534_vm0, %v1524_v55  ;;  %v1493_v45 = vadd.f32 %v1476_v11, %v1375_v53  ;;  %v1603_v5 = vpack.c.bf16 %v3933_v29, %v1595_v20  ;;  %v1575_v11 = vmul.f32 %v1567_v39, %v3623_v17  ;;  %v1153_v39 = vpop.f32.mrf.mxu1 }
 0x193   : > { %v1560_v14 = vpack.c.bf16 %v1552_v47, %v1552_v47  ;;  %v1746_v3 = vld [vmem:[#allocation2 + $0x9] sm:$0xff]  ;;  %v954_v47 = vadd.f32 %v3850_v22, %v836_v15 }
 0x194   : > { %v1505_v58 = vmul.f32 %v3909_v41, %v1493_v45  ;;  %2874 = vmatmul.msk.bf16.vlgmr.msra.gmra.mxu1 %vm534_vm0, %v1603_v5  ;;  %v1754_v2 = vpack.c.bf16 %v1746_v3, %v1746_v3  ;;  %v1271_v3 = vpop.f32.mrf.mxu2 }
 0x195   : > { %v1568_v42 = vunpack.c.l.bf16 %v1560_v14 }
 0x196   : > { %v1517_v63 = vadd.f32 %v3915_v35, %v1505_v58  ;;  %v1762_v23 = vunpack.c.l.bf16 %v1754_v2  ;;  %v1048_v58 = vadd.f32 %v3838_v13, %v954_v47 }
 0x197   : > { %v1576_v7 = vmul.f32 %v1568_v42, %v3621_v16  ;;  %v1360_v8 = vpop.f32.mrf.mxu3  ;;  %v1888_v24 = vmul.f32 %v1568_v42, %v3623_v17 }
 0x198   : > { %v1525_v60 = vmax.f32 %v1517_v63, 0.0  ;;  %v1376_v57 = vadd.f32 %v1360_v8, %v1282_v19  ;;  %v1770_v14 = vmul.f32 %v1762_v23, %v3554_v4  ;;  %v3158_v23 = vld [vmem:[%s4390_s4 + $0xb8] sm:$0xff] }
 0x199   : > { %v1583_v0 = vpack.c.bf16 %v1576_v7, %v1575_v11  ;;  %v1747_v20 = vld [vmem:[#allocation2 + $0x11] sm:$0xff]  ;;  %v837_v7 = vadd.f32 %v3842_v18, %v3809_v59  ;;  %2161 = vmatpush.bf16.msra.mxu2 %v3158_v23 }
 0x19a   : > { %v1865_v32 = vld [vmem:[#allocation2 + $0x17] sm:$0xff]  ;;  %1537 = vst.msk [vmem:[#allocation2 + $0x20] sm:$0xff] %vm534_vm0, %v1525_v60  ;;  %v1494_v55 = vadd.f32 %v1478_v56, %v1376_v57  ;;  %v1755_v53 = vpack.c.bf16 %v1747_v20, %v1747_v20  ;;  %v1283_v56 = vadd.f32 %v1269_v9, %v1165_v6  ;;  %v1166_v57 = vadd.f32 %v1153_v39, %v1048_v58  ;;  %v3151_v20 = vld [vmem:[%s4390_s4 + $0x80] sm:$0xff] }
 0x19b   : > { %2894 = vmatmul.msk.bf16.vlgmr.msrb.gmra.mxu2 %vm534_vm0, %v1583_v0  ;;  %v1873_v40 = vpack.c.bf16 %v1865_v32, %v1865_v32  ;;  %v3968_v10 = vld [vmem:[#allocation2 + $0x18] sm:$0xff]  ;;  %v955_v59 = vadd.f32 %v3864_v43, %v837_v7  ;;  %v1483_v32 = vpop.f32.mrf.mxu0  ;;  %2046 = vmatpush.bf16.msrb.mxu1 %v3151_v20 }
 0x19c   : > { %v1506_v44 = vmul.f32 %v3909_v41, %v1494_v55  ;;  %v3954_v45 = vunpack.c.l.bf16 %v1755_v53  ;;  %v1284_v55 = vadd.f32 %v1271_v3, %v1166_v57 }
 0x19d   : > { %v3956_v5 = vunpack.c.l.bf16 %v1873_v40  ;;  %v1049_v6 = vadd.f32 %v3844_v37, %v955_v59  ;;  %v3157_v37 = vld [vmem:[%s4390_s4 + $0xb0] sm:$0xff] }
 0x19e   : > { %v1518_v48 = vadd.f32 %v3915_v35, %v1506_v44  ;;  %v1771_v1 = vmul.f32 %v3954_v45, %v3563_v12  ;;  %v1156_v44 = vpop.f32.mrf.mxu1  ;;  %2162 = vmatpush.bf16.msra.mxu2 %v3157_v37 }
 0x19f   : > { %v1889_v22 = vmul.f32 %v3956_v5, %v3621_v16  ;;  %v1363_v2 = vpop.f32.mrf.mxu3  ;;  %v1577_v43 = vmul.f32 %v3956_v5, %v3650_v49 }
 0x1a0   : > { %v1526_v19 = vmax.f32 %v1518_v48, 0.0  ;;  %v1377_v63 = vadd.f32 %v1363_v2, %v1283_v56  ;;  %v1778_v9 = vpack.c.bf16 %v1771_v1, %v1770_v14  ;;  %v1274_v56 = vpop.f32.mrf.mxu2 }
 0x1a1   : > { %v1896_v11 = vpack.c.bf16 %v1889_v22, %v1888_v24  ;;  %v3970_v38 = vld [vmem:[#allocation2 + $0x20] sm:$0xff] }
 0x1a2   : > { %v1554_v8 = vld [vmem:[#allocation2 + $0x1f] sm:$0xff]  ;;  %1538 = vst.msk [vmem:[#allocation2 + $0x28] sm:$0xff] %vm534_vm0, %v1526_v19  ;;  %v1495_v42 = vadd.f32 %v1481_v52, %v1377_v63  ;;  %2922 = vmatmul.msk.bf16.vlgmr.msrb.gmra.mxu3 %vm534_vm0, %v1778_v9  ;;  %v3977_v13 = vpack.c.bf16 %v3970_v38, %v3968_v10  ;;  %v639_v52 = vadd.f32 %v3818_v61, %v3790_v28 }
 0x1a3   : > { %2950 = vmatmul.msk.bf16.vlgmr.msrb.gmra.mxu0 %vm534_vm0, %v1896_v11  ;;  %v1562_v60 = vpack.c.bf16 %v1554_v8, %v1554_v8  ;;  %v1748_v18 = vld [vmem:[#allocation2 + $0x19] sm:$0xff]  ;;  %v1486_v59 = vpop.f32.mrf.mxu0 }
 0x1a4   : > { %v1507_v0 = vmul.f32 %v3909_v41, %v1495_v42  ;;  %2875 = vmatmul.msk.bf16.gmra.mxu1 %vm534_vm0, %v3977_v13  ;;  %v1756_v54 = vpack.c.bf16 %v1748_v18, %v1748_v18  ;;  %v838_v48 = vadd.f32 %v3848_v21, %v639_v52  ;;  %v3162_v61 = vld [vmem:[%s4390_s4 + $0xd8] sm:$0xff]  ;;  %v1167_v21 = vadd.f32 %v1156_v44, %v1049_v6 }
 0x1a5   : > { %v3983_v15 = vunpack.c.l.bf16 %v1562_v60  ;;  %2279 = vmatpush.bf16.msra.mxu3 %v3162_v61 }
 0x1a6   : > { %v1519_v53 = vadd.f32 %v3915_v35, %v1507_v0  ;;  %v4002_v2 = vunpack.c.l.bf16 %v1756_v54  ;;  %v956_v19 = vadd.f32 %v3885_v51, %v838_v48  ;;  %v1285_v7 = vadd.f32 %v1274_v56, %v1167_v21  ;;  %v1158_v6 = vpop.f32.mrf.mxu1  ;;  %v3155_v21 = vld [vmem:[%s4390_s4 + $0xa0] sm:$0xff] }
 0x1a7   : > { %v1578_v40 = vmul.f32 %v3983_v15, %v3637_v30  ;;  %v1365_v47 = vpop.f32.mrf.mxu3  ;;  %v1890_v8 = vmul.f32 %v3983_v15, %v3650_v49 }
 0x1a8   : > { %v1527_v14 = vmax.f32 %v1519_v53, 0.0  ;;  %v1378_v39 = vadd.f32 %v1365_v47, %v1284_v55  ;;  %v1772_v60 = vmul.f32 %v4002_v2, %v3629_v25  ;;  %v1050_v18 = vadd.f32 %v3852_v62, %v956_v19  ;;  %v1276_v47 = vpop.f32.mrf.mxu2  ;;  %v3165_v19 = vld [vmem:[%s4390_s4 + $0xf0] sm:$0xff] }
 0x1a9   : > { %v1584_v3 = vpack.c.bf16 %v1578_v40, %v1577_v43  ;;  %v1749_v1 = vld [vmem:[#allocation2 + $0x21] sm:$0xff]  ;;  %v4028_v20 = vmul.f32 %v4002_v2, %v3554_v4 }
 0x1aa   : > { %v1867_v24 = vld [vmem:[#allocation2 + $0x27] sm:$0xff]  ;;  %1539 = vst.msk [vmem:[#allocation2 + $0x30] sm:$0xff] %vm534_vm0, %v1527_v14  ;;  %v1496_v22 = vadd.f32 %v1483_v32, %v1378_v39  ;;  %v1757_v58 = vpack.c.bf16 %v1749_v1, %v1749_v1  ;;  %v3166_v39 = vld [vmem:[%s4390_s4 + $0xf8] sm:$0xff]  ;;  %v1168_v48 = vadd.f32 %v1158_v6, %v1050_v18 }
 0x1ab   : > { %2895 = vmatmul.msk.bf16.gmra.mxu2 %vm534_vm0, %v1584_v3  ;;  %v1875_v28 = vpack.c.bf16 %v1867_v24, %v1867_v24  ;;  %v4034_v40 = vld [vmem:[#allocation2 + $0x28] sm:$0xff]  ;;  %2373 = vmatpush.bf16.msra.mxu0 %v3166_v39  ;;  %v3159_v39 = vld [vmem:[%s4390_s4 + $0xc0] sm:$0xff] }
 0x1ac   : > { %v1508_v63 = vmul.f32 %v3909_v41, %v1496_v22  ;;  %v4012_v9 = vunpack.c.l.bf16 %v1757_v58  ;;  %v3156_v3 = vld [vmem:[%s4390_s4 + $0xa8] sm:$0xff]  ;;  %v3170_v58 = vld [vmem:[%s4390_s4 + $0x118] sm:$0xff]  ;;  %v1286_v61 = vadd.f32 %v1276_v47, %v1168_v48 }
 0x1ad   : > { %v4014_v11 = vunpack.c.l.bf16 %v1875_v28  ;;  %v3161_v28 = vld [vmem:[%s4390_s4 + $0xd0] sm:$0xff]  ;;  %2163 = vmatpush.bf16.msra.mxu2 %v3156_v3  ;;  %2491 = vmatpush.bf16.msra.mxu1 %v3170_v58  ;;  %v3164_v6 = vld [vmem:[%s4390_s4 + $0xe8] sm:$0xff]  ;;  %v3163_v3 = vld [vmem:[%s4390_s4 + $0xe0] sm:$0xff] }
 0x1ae   : > { %v1520_v42 = vadd.f32 %v3915_v35, %v1508_v63  ;;  %v1773_v51 = vmul.f32 %v4012_v9, %v3652_v50  ;;  %v4032_v23 = vmul.f32 %v4012_v9, %v3563_v12  ;;  %2280 = vmatpush.bf16.msra.mxu3 %v3161_v28 }
 0x1af   : > { %v1891_v57 = vmul.f32 %v4014_v11, %v3637_v30  ;;  %v1368_v0 = vpop.f32.mrf.mxu3  ;;  %v1579_v37 = vmul.f32 %v4014_v11, %v3581_v36  ;;  %2374 = vmatpush.bf16.msra.mxu0 %v3165_v19 }
 0x1b0   : > { %v1528_v32 = vmax.f32 %v1520_v42, 0.0  ;;  %v1379_v55 = vadd.f32 %v1368_v0, %v1285_v7  ;;  %v1779_v43 = vpack.c.bf16 %v1773_v51, %v1772_v60  ;;  %v2438_v62 = vpack.c.bf16 %v4032_v23, %v4028_v20  ;;  %v2413_v23 = vld [vmem:[#allocation2 + $0x51] sm:$0xff] }
 0x1b1   : > { %v1897_v53 = vpack.c.bf16 %v1891_v57, %v1890_v8  ;;  %v4036_v54 = vld [vmem:[#allocation2 + $0x30] sm:$0xff]  ;;  %2164 = vmatpush.bf16.msra.mxu2 %v3155_v21 }
 0x1b2   : > { %v1556_v52 = vld [vmem:[#allocation2 + $0x2f] sm:$0xff]  ;;  %1540 = vst.msk [vmem:[#allocation2 + $0x38] sm:$0xff] %vm534_vm0, %v1528_v32  ;;  %v1497_v44 = vadd.f32 %v1486_v59, %v1379_v55  ;;  %2923 = vmatmul.msk.bf16.gmra.mxu3 %vm534_vm0, %v1779_v43  ;;  %v4045_v56 = vpack.c.bf16 %v4036_v54, %v4034_v40  ;;  %v1488_v59 = vpop.f32.mrf.mxu0 }
 0x1b3   : > { %2951 = vmatmul.msk.bf16.gmra.mxu0 %vm534_vm0, %v1897_v53  ;;  %v1564_v14 = vpack.c.bf16 %v1556_v52, %v1556_v52  ;;  %v1750_v1 = vld [vmem:[#allocation2 + $0x29] sm:$0xff] }
 0x1b4   : > { %v1509_v24 = vmul.f32 %v3909_v41, %v1497_v44  ;;  %2876 = vmatmul.msk.bf16.gmra.mxu1 %vm534_vm0, %v4045_v56  ;;  %v1758_v8 = vpack.c.bf16 %v1750_v1, %v1750_v1  ;;  %v3160_v52 = vld [vmem:[%s4390_s4 + $0xc8] sm:$0xff]  ;;  %2375 = vmatpush.bf16.msra.mxu0 %v3164_v6 }
 0x1b5   : > { %v4056_v22 = vunpack.c.l.bf16 %v1564_v14  ;;  %2281 = vmatpush.bf16.msra.mxu3 %v3160_v52 }
 0x1b6   : > { %v1521_v63 = vadd.f32 %v3915_v35, %v1509_v24  ;;  %v4077_v43 = vunpack.c.l.bf16 %v1758_v8 }
 0x1b7   : > { %v1580_v7 = vmul.f32 %v4056_v22, %v3592_v46  ;;  %v1370_v42 = vpop.f32.mrf.mxu3  ;;  %v1892_v48 = vmul.f32 %v4056_v22, %v3581_v36 }
 0x1b8   : > { %v1529_v60 = vmax.f32 %v1521_v63, 0.0  ;;  %v1380_v51 = vadd.f32 %v1370_v42, %v1286_v61  ;;  %v4107_v28 = vmul.f32 %v4077_v43, %v3629_v25  ;;  %2376 = vmatpush.bf16.msra.mxu0 %v3163_v3 }
 0x1b9   : > { %v1585_v57 = vpack.c.bf16 %v1580_v7, %v1579_v37  ;;  %v1751_v18 = vld [vmem:[#allocation2 + $0x31] sm:$0xff]  ;;  %2282 = vmatpush.bf16.msra.mxu3 %v3159_v39 }
 0x1ba   : > { %v1869_v0 = vld [vmem:[#allocation2 + $0x37] sm:$0xff]  ;;  %1541 = vst.msk [vmem:[#allocation2 + $0x40] sm:$0xff] %vm534_vm0, %v1529_v60  ;;  %v1498_v32 = vadd.f32 %v1488_v59, %v1380_v51  ;;  %v1759_v55 = vpack.c.bf16 %v1751_v18, %v1751_v18 }
 0x1bb   : > { %2896 = vmatmul.msk.bf16.gmra.mxu2 %vm534_vm0, %v1585_v57  ;;  %v1877_v53 = vpack.c.bf16 %v1869_v0, %v1869_v0  ;;  %v4113_v19 = vld [vmem:[#allocation2 + $0x38] sm:$0xff]  ;;  %v3169_v59 = vld [vmem:[%s4390_s4 + $0x110] sm:$0xff] }
 0x1bc   : > { %v1510_v47 = vmul.f32 %v3909_v41, %v1498_v32  ;;  %v4086_v44 = vunpack.c.l.bf16 %v1759_v55  ;;  %v1774_v41 = vmul.f32 %v4077_v43, %v3689_v33  ;;  %2492 = vmatpush.bf16.msra.mxu1 %v3169_v59  ;;  %v1990_v59 = vpack.c.bf16 %v3968_v10, %v3933_v29 }
 0x1bd   : > { %v4088_v14 = vunpack.c.l.bf16 %v1877_v53  ;;  %v2218_v29 = vmul.f32 %v3956_v5, %v3623_v17  ;;  %v2102_v17 = vmul.f32 %v4012_v9, %v3629_v25  ;;  %v2221_v5 = vmul.f32 %v4056_v22, %v3637_v30 }
 0x1be   : > { %v1522_v1 = vadd.f32 %v3915_v35, %v1510_v47  ;;  %v1775_v24 = vmul.f32 %v4086_v44, %v3687_v31  ;;  %v4111_v61 = vmul.f32 %v4086_v44, %v3652_v50 }
 0x1bf   : > { %v1893_v58 = vmul.f32 %v4088_v14, %v3592_v46  ;;  %v1581_v18 = vmul.f32 %v4088_v14, %v3633_v26 }
 0x1c0   : > { %v1530_v37 = vmax.f32 %v1522_v1, 0.0  ;;  %v1780_v21 = vpack.c.bf16 %v1775_v24, %v1774_v41  ;;  %v2439_v8 = vpack.c.bf16 %v4111_v61, %v4107_v28  ;;  %v4401_v41 = vld [vmem:[#allocation9_spill] sm:$0xff] }
 0x1c1   : > { %v1898_v35 = vpack.c.bf16 %v1893_v58, %v1892_v48  ;;  %v4115_v63 = vld [vmem:[#allocation2 + $0x40] sm:$0xff] }
 0x1c2   : > { %v1558_v7 = vld [vmem:[#allocation2 + $0x3f] sm:$0xff]  ;;  %1542 = vst.msk [vmem:[#allocation2 + $0x48] sm:$0xff] %vm534_vm0, %v1530_v37  ;;  %2924 = vmatmul.msk.bf16.gmra.mxu3 %vm534_vm0, %v1780_v21  ;;  %v4124_v42 = vpack.c.bf16 %v4115_v63, %v4113_v19 }
 0x1c3   : > { %2952 = vmatmul.msk.bf16.gmra.mxu0 %vm534_vm0, %v1898_v35  ;;  %v1566_v60 = vpack.c.bf16 %v1558_v7, %v1558_v7  ;;  %v1752_v51 = vld [vmem:[#allocation2 + $0x39] sm:$0xff] }
 0x1c4   : > { %2877 = vmatmul.msk.bf16.gmra.mxu1 %vm534_vm0, %v4124_v42  ;;  %v1760_v32 = vpack.c.bf16 %v1752_v51, %v1752_v51 }
 0x1c5   : > { %v1574_v57 = vunpack.c.l.bf16 %v1566_v60 }
 0x1c6   : > { %v1768_v47 = vunpack.c.l.bf16 %v1760_v32  ;;  %v2100_v32 = vmul.f32 %v3954_v45, %v3554_v4  ;;  %v2103_v4 = vmul.f32 %v4077_v43, %v3652_v50  ;;  %v1992_v50 = vpack.c.bf16 %v4113_v19, %v4036_v54 }
 0x1c7   : > { %v1582_v0 = vmul.f32 %v1574_v57, %v3635_v27  ;;  %v1894_v58 = vmul.f32 %v1574_v57, %v3633_v26 }
 0x1c8   : > { %v1776_v1 = vmul.f32 %v1768_v47, %v3721_v34  ;;  %v4140_v21 = vmul.f32 %v1768_v47, %v3689_v33  ;;  %v2109_v45 = vpack.c.bf16 %v2103_v4, %v2102_v17  ;;  %v2105_v25 = vmul.f32 %v1768_v47, %v3687_v31 }
 0x1c9   : > { %v1586_v55 = vpack.c.bf16 %v1582_v0, %v1581_v18  ;;  %v1753_v53 = vld [vmem:[#allocation2 + $0x41] sm:$0xff]  ;;  %v2101_v18 = vmul.f32 %v4002_v2, %v3563_v12  ;;  %v1991_v12 = vpack.c.bf16 %v4034_v40, %v3970_v38  ;;  %v2220_v38 = vmul.f32 %v4014_v11, %v3650_v49  ;;  %v2083_v2 = vld [vmem:[#allocation2 + $0x49] sm:$0xff] }
 0x1ca   : > { %v1871_v52 = vld [vmem:[#allocation2 + $0x47] sm:$0xff]  ;;  %v1761_v6 = vpack.c.bf16 %v1753_v53, %v1753_v53  ;;  %v2219_v53 = vmul.f32 %v3983_v15, %v3621_v16  ;;  %v2104_v15 = vmul.f32 %v4086_v44, %v3689_v33  ;;  %v2223_v49 = vmul.f32 %v1574_v57, %v3592_v46  ;;  %v2201_v22 = vld [vmem:[#allocation2 + $0x4f] sm:$0xff] }
 0x1cb   : > { %2897 = vmatmul.msk.bf16.gmra.mxu2 %vm534_vm0, %v1586_v55  ;;  %v1879_v39 = vpack.c.bf16 %v1871_v52, %v1871_v52  ;;  %v3168_v0 = vld [vmem:[%s4390_s4 + $0x108] sm:$0xff]  ;;  %v2108_v55 = vpack.c.bf16 %v2101_v18, %v2100_v32  ;;  %v3167_v16 = vld [vmem:[%s4390_s4 + $0x100] sm:$0xff]  ;;  %v2091_v9 = vpack.c.bf16 %v2083_v2, %v2083_v2  ;;  %v2222_v11 = vmul.f32 %v4088_v14, %v3581_v36  ;;  %v2319_v57 = vld [vmem:[#allocation2 + $0x50] sm:$0xff] }
 0x1cc   : > { %v1769_v3 = vunpack.c.l.bf16 %v1761_v6  ;;  %2493 = vmatpush.bf16.msra.mxu1 %v3168_v0  ;;  %v2226_v10 = vpack.c.bf16 %v2219_v53, %v2218_v29  ;;  %v2110_v30 = vpack.c.bf16 %v2105_v25, %v2104_v15  ;;  %v1989_v40 = vld [vmem:[#allocation2 + $0x48] sm:$0xff]  ;;  %v2209_v43 = vpack.c.bf16 %v2201_v22, %v2201_v22 }
 0x1cd   : > { %v1887_v48 = vunpack.c.l.bf16 %v1879_v39  ;;  %v2099_v54 = vunpack.c.l.bf16 %v2091_v9 }
 0x1ce   : > { %v1777_v24 = vmul.f32 %v1769_v3, %v4401_v41  ;;  %v4143_v35 = vmul.f32 %v1769_v3, %v3687_v31  ;;  %v1993_v31 = vpack.c.bf16 %v1989_v40, %v4115_v63  ;;  %v2106_v33 = vmul.f32 %v1769_v3, %v3721_v34 }
 0x1cf   : > { %v1895_v37 = vmul.f32 %v1887_v48, %v3635_v27  ;;  %v2107_v46 = vmul.f32 %v2099_v54, %v4401_v41  ;;  %v2217_v36 = vunpack.c.l.bf16 %v2209_v43  ;;  %v2224_v14 = vmul.f32 %v1887_v48, %v3633_v26 }
 0x1d0   : > { %v1781_v7 = vpack.c.bf16 %v1777_v24, %v1776_v1  ;;  %v2440_v51 = vpack.c.bf16 %v4143_v35, %v4140_v21  ;;  %2494 = vmatpush.bf16.msra.mxu1 %v3167_v16 }
 0x1d1   : > { %v1899_v60 = vpack.c.bf16 %v1895_v37, %v1894_v58  ;;  %v2111_v44 = vpack.c.bf16 %v2107_v46, %v2106_v33  ;;  %v2225_v19 = vmul.f32 %v2217_v36, %v3635_v27  ;;  %v2436_v58 = vmul.f32 %v2099_v54, %v3721_v34 }
 0x1d2   : > { %2925 = vmatmul.msk.bf16.gmra.mxu3 %vm534_vm0, %v1781_v7 }
 0x1d3   : > { %2953 = vmatmul.msk.bf16.gmra.mxu0 %vm534_vm0, %v1899_v60  ;;  %v2229_v52 = vpack.c.bf16 %v2225_v19, %v2224_v14 }
 0x1d4   : > { %2978 = vmatmul.msk.bf16.vlgmr.msrb.gmra.mxu1 %vm534_vm0, %v1990_v59 }
 0x1db   : > { %3006 = vmatmul.msk.bf16.vlgmr.msra.gmra.mxu2 %vm534_vm0, %v2108_v55 }
 0x1e2   : > { %3034 = vmatmul.msk.bf16.vlgmr.msra.gmra.mxu3 %vm534_vm0, %v2226_v10 }
 0x1e3   : > { %3062 = vmatmul.msk.bf16.vlgmr.msra.gmra.mxu0 %vm534_vm0, %v3977_v13  ;;  %v2227_v13 = vpack.c.bf16 %v2221_v5, %v2220_v38 }
 0x1e4   : > { %2979 = vmatmul.msk.bf16.gmra.mxu1 %vm534_vm0, %v1991_v12 }
 0x1eb   : > { %3007 = vmatmul.msk.bf16.gmra.mxu2 %vm534_vm0, %v2109_v45 }
 0x1f2   : > { %3035 = vmatmul.msk.bf16.gmra.mxu3 %vm534_vm0, %v2227_v13 }
 0x1f3   : > { %3063 = vmatmul.msk.bf16.gmra.mxu0 %vm534_vm0, %v4045_v56  ;;  %v2228_v56 = vpack.c.bf16 %v2223_v49, %v2222_v11 }
 0x1f4   : > { %2980 = vmatmul.msk.bf16.gmra.mxu1 %vm534_vm0, %v1992_v50 }
 0x1fb   : > { %3008 = vmatmul.msk.bf16.gmra.mxu2 %vm534_vm0, %v2110_v30 }
 0x202   : > { %3036 = vmatmul.msk.bf16.gmra.mxu3 %vm534_vm0, %v2228_v56 }
 0x203   : > { %3064 = vmatmul.msk.bf16.gmra.mxu0 %vm534_vm0, %v4124_v42  ;;  %v2323_v42 = vpack.c.bf16 %v2319_v57, %v1989_v40 }
 0x204   : > { %2981 = vmatmul.msk.bf16.gmra.mxu1 %vm534_vm0, %v1993_v31 }
 0x20b   : > { %3009 = vmatmul.msk.bf16.gmra.mxu2 %vm534_vm0, %v2111_v44 }
 0x211   : > { %v1661_v6 = vpop.f32.mrf.mxu1 }
 0x212   : > { %3037 = vmatmul.msk.bf16.gmra.mxu3 %vm534_vm0, %v2229_v52 }
 0x213   : > { %3065 = vmatmul.msk.bf16.gmra.mxu0 %vm534_vm0, %v2323_v42 }
 0x214   : > { %3090 = vmatmul.msk.bf16.vlgmr.msra.gmra.mxu1 %vm534_vm0, %v2438_v62  ;;  %v2421_v62 = vpack.c.bf16 %v2413_v23, %v2413_v23  ;;  %v4281_v23 = vld [vmem:[%s4392_s6] ss:$0 sm:$0xff] }
 0x216   : > { %v2429_v61 = vunpack.c.l.bf16 %v2421_v62 }
 0x218   : > { %v2437_v7 = vmul.f32 %v2429_v61, %v4401_v41  ;;  %v1543_v61 = vld [vmem:[%s3482_s17 + $0x10] sm:$0xff] }
 0x219   : > { %v1663_v63 = vpop.f32.mrf.mxu1 }
 0x21a   : > { %v2441_v59 = vpack.c.bf16 %v2437_v7, %v2436_v58 }
 0x21e   : > { %v1726_v26 = vpop.f32.mrf.mxu2 }
 0x21f   : > { %v1727_v49 = vadd.f32 %v1726_v26, %v1661_v6 }
 0x220   : > { %v1954_v3 = vpop.f32.mrf.mxu0 }
 0x221   : > { %v4211_v47 = vpop.f32.mrf.mxu1 }
 0x224   : > { %3091 = vmatmul.msk.bf16.gmra.mxu1 %vm534_vm0, %v2439_v8 }
 0x225   : > { %v1836_v39 = vpop.f32.mrf.mxu3 }
 0x226   : > { %v1728_v1 = vpop.f32.mrf.mxu2  ;;  %v1856_v40 = vadd.f32 %v1836_v39, %v1727_v49 }
 0x227   : > { %v1729_v31 = vadd.f32 %v1728_v1, %v1663_v63  ;;  %v4276_v63 = vld [vmem:[%s4391_s5] ss:$0 sm:$0xff] }
 0x228   : > { %v1956_v28 = vpop.f32.mrf.mxu0  ;;  %v1974_v22 = vadd.f32 %v1954_v3, %v1856_v40 }
 0x229   : > { %v4217_v27 = vpop.f32.mrf.mxu1 }
 0x22d   : > { %v1838_v20 = vpop.f32.mrf.mxu3 }
 0x22e   : > { %v1731_v8 = vpop.f32.mrf.mxu2  ;;  %v1857_v43 = vadd.f32 %v1838_v20, %v1729_v31 }
 0x22f   : > { %v1732_v42 = vadd.f32 %v1731_v8, %v4211_v47 }
 0x230   : > { %v1959_v21 = vpop.f32.mrf.mxu0  ;;  %v1975_v57 = vadd.f32 %v1956_v28, %v1857_v43 }
 0x231   : > { %v4219_v48 = vpop.f32.mrf.mxu1 }
 0x234   : > { %3092 = vmatmul.msk.bf16.gmra.mxu1 %vm534_vm0, %v2440_v51 }
 0x235   : > { %v1841_v37 = vpop.f32.mrf.mxu3 }
 0x236   : > { %v1733_v35 = vpop.f32.mrf.mxu2  ;;  %v1858_v3 = vadd.f32 %v1841_v37, %v1732_v42 }
 0x237   : > { %v1734_v7 = vadd.f32 %v1733_v35, %v4217_v27 }
 0x238   : > { %v4236_v0 = vpop.f32.mrf.mxu0  ;;  %v1976_v8 = vadd.f32 %v1959_v21, %v1858_v3 }
 0x239   : > { %v4225_v24 = vpop.f32.mrf.mxu1 }
 0x23d   : > { %v4232_v51 = vpop.f32.mrf.mxu3 }
 0x23e   : > { %v4238_v32 = vpop.f32.mrf.mxu2  ;;  %v1859_v49 = vadd.f32 %v4232_v51, %v1734_v7 }
 0x23f   : > { %v1737_v51 = vadd.f32 %v4238_v32, %v4219_v48 }
 0x240   : > { %v4242_v53 = vpop.f32.mrf.mxu0  ;;  %v1977_v27 = vadd.f32 %v4236_v0, %v1859_v49 }
 0x241   : > { %v4229_v60 = vpop.f32.mrf.mxu1 }
 0x244   : > { %3093 = vmatmul.msk.bf16.gmra.mxu1 %vm534_vm0, %v2441_v59 }
 0x245   : > { %v4240_v34 = vpop.f32.mrf.mxu3 }
 0x246   : > { %v4244_v29 = vpop.f32.mrf.mxu2 }
 0x248   : > { %v4248_v4 = vpop.f32.mrf.mxu0 }
 0x249   : > { %v4234_v18 = vpop.f32.mrf.mxu1 }
 0x24d   : > { %v4246_v10 = vpop.f32.mrf.mxu3 }
 0x24e   : > { %v4250_v16 = vpop.f32.mrf.mxu2 }
 0x250   : > { %v4256_v5 = vpop.f32.mrf.mxu0 }
 0x251   : > { %v2048_v55 = vpop.f32.mrf.mxu1 }
 0x252   : > { %v2068_v33 = vadd.f32 %v2048_v55, %v1974_v22  ;;  %v1544_v22 = vld [vmem:[%s3482_s17 + $0x18] sm:$0xff] }
 0x255   : > { %v4252_v17 = vpop.f32.mrf.mxu3 }
 0x256   : > { %v4258_v38 = vpop.f32.mrf.mxu2 }
 0x258   : > { %v4264_v25 = vpop.f32.mrf.mxu0 }
 0x259   : > { %v2050_v41 = vpop.f32.mrf.mxu1 }
 0x25a   : > { %v2069_v6 = vadd.f32 %v2050_v41, %v1975_v57 }
 0x25d   : > { %v4260_v13 = vpop.f32.mrf.mxu3 }
 0x25e   : > { %v2166_v15 = vpop.f32.mrf.mxu2 }
 0x25f   : > { %v2186_v44 = vadd.f32 %v2166_v15, %v2068_v33 }
 0x260   : > { %v2378_v9 = vpop.f32.mrf.mxu0 }
 0x261   : > { %v2053_v12 = vpop.f32.mrf.mxu1 }
 0x262   : > { %v2070_v59 = vadd.f32 %v2053_v12, %v1976_v8 }
 0x265   : > { %v2284_v2 = vpop.f32.mrf.mxu3 }
 0x266   : > { %v2168_v56 = vpop.f32.mrf.mxu2  ;;  %v2304_v14 = vadd.f32 %v2284_v2, %v2186_v44 }
 0x267   : > { %v2187_v1 = vadd.f32 %v2168_v56, %v2069_v6 }
 0x268   : > { %v2380_v36 = vpop.f32.mrf.mxu0  ;;  %v2398_v26 = vadd.f32 %v2378_v9, %v2304_v14  ;;  %v1860_v14 = vadd.f32 %v4240_v34, %v1737_v51 }
 0x269   : > { %v4254_v45 = vpop.f32.mrf.mxu1 }
 0x26a   : > { %v2071_v31 = vadd.f32 %v4254_v45, %v1977_v27  ;;  %v1978_v48 = vadd.f32 %v4242_v53, %v1860_v14  ;;  %v1739_v45 = vadd.f32 %v4244_v29, %v4225_v24  ;;  %v1546_v24 = vld [vmem:[%s3482_s17 + $0x28] sm:$0xff]  ;;  %v1548_v14 = vld [vmem:[%s3482_s17 + $0x38] sm:$0xff] }
 0x26d   : > { %v2286_v54 = vpop.f32.mrf.mxu3 }
 0x26e   : > { %v2171_v19 = vpop.f32.mrf.mxu2  ;;  %v2305_v62 = vadd.f32 %v2286_v54, %v2187_v1 }
 0x26f   : > { %v2188_v9 = vadd.f32 %v2171_v19, %v2070_v59 }
 0x270   : > { %v2383_v28 = vpop.f32.mrf.mxu0  ;;  %v2399_v41 = vadd.f32 %v2380_v36, %v2305_v62  ;;  %v1861_v62 = vadd.f32 %v4246_v10, %v1739_v45  ;;  %v1742_v10 = vadd.f32 %v4250_v16, %v4229_v60 }
 0x271   : > { %v4262_v50 = vpop.f32.mrf.mxu1 }
 0x272   : > { %v2072_v34 = vadd.f32 %v4262_v50, %v1978_v48  ;;  %v1979_v29 = vadd.f32 %v4248_v4, %v1861_v62 }
 0x275   : > { %v2289_v52 = vpop.f32.mrf.mxu3 }
 0x276   : > { %v2173_v37 = vpop.f32.mrf.mxu2  ;;  %v2306_v54 = vadd.f32 %v2289_v52, %v2188_v9 }
 0x277   : > { %v2189_v19 = vadd.f32 %v2173_v37, %v2071_v31 }
 0x278   : > { %v2385_v12 = vpop.f32.mrf.mxu0  ;;  %v2400_v43 = vadd.f32 %v2383_v28, %v2306_v54 }
 0x279   : > { %v4266_v30 = vpop.f32.mrf.mxu1 }
 0x27a   : > { %v2073_v7 = vadd.f32 %v4266_v30, %v1979_v29 }
 0x27d   : > { %v2291_v15 = vpop.f32.mrf.mxu3 }
 0x27e   : > { %v2176_v44 = vpop.f32.mrf.mxu2  ;;  %v2307_v0 = vadd.f32 %v2291_v15, %v2189_v19  ;;  %v1862_v15 = vadd.f32 %v4252_v17, %v1742_v10  ;;  %v1744_v17 = vadd.f32 %v4258_v38, %v4234_v18 }
 0x280   : > { %v2401_v3 = vadd.f32 %v2385_v12, %v2307_v0  ;;  %v2388_v1 = vpop.f32.mrf.mxu0  ;;  %v1980_v60 = vadd.f32 %v4256_v5, %v1862_v15  ;;  %v1863_v51 = vadd.f32 %v4260_v13, %v1744_v17 }
 0x281   : > { %v4268_v11 = vpop.f32.mrf.mxu1 }
 0x282   : > { %v1981_v18 = vadd.f32 %v4264_v25, %v1863_v51 }
 0x285   : > { %v2294_v42 = vpop.f32.mrf.mxu3 }
 0x286   : > { %v2178_v8 = vpop.f32.mrf.mxu2 }
 0x289   : > { %v4270_v46 = vpop.f32.mrf.mxu1 }
 0x28a   : > { %v2075_v19 = vadd.f32 %v4270_v46, %v1981_v18 }
 0x28d   : > { %v2296_v37 = vpop.f32.mrf.mxu3 }
 0x28e   : > { %v2181_v54 = vpop.f32.mrf.mxu2 }
 0x291   : > { %v2496_v39 = vpop.f32.mrf.mxu1 }
 0x292   : > { %v2516_v20 = vadd.f32 %v2496_v39, %v2398_v26  ;;  %v1545_v26 = vld [vmem:[%s3482_s17 + $0x20] sm:$0xff] }
 0x294   : > { %v2528_v47 = vmul.f32 %v4276_v63, %v2516_v20 }
 0x295   : > { %v2299_v30 = vpop.f32.mrf.mxu3 }
 0x296   : > { %v2540_v58 = vadd.f32 %v4281_v23, %v2528_v47  ;;  %v2190_v47 = vadd.f32 %v2176_v44, %v2072_v34 }
 0x298   : > { %v2548_v55 = vadd.f32 %v2540_v58, %v1543_v61  ;;  %v2308_v58 = vadd.f32 %v2294_v42, %v2190_v47  ;;  %v1550_v47 = vld [vmem:[%s3482_s17 + $0x48] sm:$0xff] }
 0x299   : > { %v2498_v2 = vpop.f32.mrf.mxu1 }
 0x29a   : > { %v2556_v40 = vmax.f32 %v2548_v55, 0.0  ;;  %v2517_v56 = vadd.f32 %v2498_v2, %v2399_v41  ;;  %v2402_v55 = vadd.f32 %v2388_v1, %v2308_v58  ;;  %v2191_v2 = vadd.f32 %v2178_v8, %v2073_v7 }
 0x29c   : > { %2564 = vst.msk [vmem:[%s4291_s25] sm:$0xff] %vm534_vm0, %v2556_v40  ;;  %v2529_v21 = vmul.f32 %v4276_v63, %v2517_v56  ;;  %v2390_v40 = vpop.f32.mrf.mxu0  ;;  %v2309_v56 = vadd.f32 %v2296_v37, %v2191_v2 }
 0x29e   : > { %v2541_v35 = vadd.f32 %v4281_v23, %v2529_v21  ;;  %v1547_v21 = vld [vmem:[%s3482_s17 + $0x30] sm:$0xff] }
 0x2a0   : > { %v2549_v33 = vadd.f32 %v2541_v35, %v1544_v22  ;;  %v2074_v22 = vadd.f32 %v4268_v11, %v1980_v60  ;;  %v2403_v35 = vadd.f32 %v2390_v40, %v2309_v56  ;;  %v2183_v11 = vpop.f32.mrf.mxu2 }
 0x2a1   : > { %v2501_v36 = vpop.f32.mrf.mxu1  ;;  %v2193_v0 = vadd.f32 %v2183_v11, %v2075_v19 }
 0x2a2   : > { %v2557_v57 = vmax.f32 %v2549_v33, 0.0  ;;  %v2518_v52 = vadd.f32 %v2501_v36, %v2400_v43  ;;  %v2192_v31 = vadd.f32 %v2181_v54, %v2074_v22 }
 0x2a4   : > { %2565 = vst.msk [vmem:[%s4291_s25 + $0x8] sm:$0xff] %vm534_vm0, %v2557_v57  ;;  %v2530_v6 = vmul.f32 %v4276_v63, %v2518_v52  ;;  %v2310_v44 = vadd.f32 %v2299_v30, %v2192_v31  ;;  %v2393_v36 = vpop.f32.mrf.mxu0  ;;  %v2301_v52 = vpop.f32.mrf.mxu3 }
 0x2a5   : > { %v2311_v48 = vadd.f32 %v2301_v52, %v2193_v0 }
 0x2a6   : > { %v2542_v32 = vadd.f32 %v4281_v23, %v2530_v6  ;;  %v2404_v57 = vadd.f32 %v2393_v36, %v2310_v44 }
 0x2a8   : > { %v2550_v39 = vadd.f32 %v2542_v32, %v1545_v26  ;;  %v1549_v32 = vld [vmem:[%s3482_s17 + $0x40] sm:$0xff] }
 0x2a9   : > { %v2503_v20 = vpop.f32.mrf.mxu1 }
 0x2aa   : > { %v2558_v28 = vmax.f32 %v2550_v39, 0.0  ;;  %v2519_v61 = vadd.f32 %v2503_v20, %v2401_v3 }
 0x2ac   : > { %2566 = vst.msk [vmem:[%s4291_s25 + $0x10] sm:$0xff] %vm534_vm0, %v2558_v28  ;;  %v2531_v53 = vmul.f32 %v4276_v63, %v2519_v61  ;;  %v2395_v46 = vpop.f32.mrf.mxu0 }
 0x2ad   : > { %v2405_v39 = vadd.f32 %v2395_v46, %v2311_v48 }
 0x2ae   : > { %v2543_v50 = vadd.f32 %v4281_v23, %v2531_v53 }
 0x2b0   : > { %v2551_v59 = vadd.f32 %v2543_v50, %v1546_v24 }
 0x2b1   : > { %v2506_v41 = vpop.f32.mrf.mxu1 }
 0x2b2   : > { %v2559_v49 = vmax.f32 %v2551_v59, 0.0  ;;  %v2520_v9 = vadd.f32 %v2506_v41, %v2402_v55 }
 0x2b4   : > { %2567 = vst.msk [vmem:[%s4291_s25 + $0x18] sm:$0xff] %vm534_vm0, %v2559_v49  ;;  %v2532_v4 = vmul.f32 %v4276_v63, %v2520_v9 }
 0x2b6   : > { %v2544_v16 = vadd.f32 %v4281_v23, %v2532_v4 }
 0x2b8   : > { %v2552_v27 = vadd.f32 %v2544_v16, %v1547_v21 }
 0x2b9   : > { %v2508_v12 = vpop.f32.mrf.mxu1 }
 0x2ba   : > { %v2560_v33 = vmax.f32 %v2552_v27, 0.0  ;;  %v2521_v43 = vadd.f32 %v2508_v12, %v2403_v35 }
 0x2bc   : > { %2568 = vst.msk [vmem:[%s4291_s25 + $0x20] sm:$0xff] %vm534_vm0, %v2560_v33  ;;  %v2533_v5 = vmul.f32 %v4276_v63, %v2521_v43 }
 0x2be   : > { %v2545_v38 = vadd.f32 %v4281_v23, %v2533_v5 }
 0x2c0   : > { %v2553_v13 = vadd.f32 %v2545_v38, %v1548_v14 }
 0x2c1   : > { %v2511_v42 = vpop.f32.mrf.mxu1 }
 0x2c2   : > { %v2561_v6 = vmax.f32 %v2553_v13, 0.0  ;;  %v2522_v26 = vadd.f32 %v2511_v42, %v2404_v57 }
 0x2c4   : > { %2569 = vst.msk [vmem:[%s4291_s25 + $0x28] sm:$0xff] %vm534_vm0, %v2561_v6  ;;  %v2534_v25 = vmul.f32 %v4276_v63, %v2522_v26 }
 0x2c6   : > { %v2546_v45 = vadd.f32 %v4281_v23, %v2534_v25 }
 0x2c8   : > { %v2554_v34 = vadd.f32 %v2546_v45, %v1549_v32 }
 0x2c9   : > { %v2513_v3 = vpop.f32.mrf.mxu1 }
 0x2ca   : > { %v2562_v1 = vmax.f32 %v2554_v34, 0.0  ;;  %v2523_v20 = vadd.f32 %v2513_v3, %v2405_v39 }
 0x2cc   : > { %2570 = vst.msk [vmem:[%s4291_s25 + $0x30] sm:$0xff] %vm534_vm0, %v2562_v1  ;;  %v2535_v62 = vmul.f32 %v4276_v63, %v2523_v20 }
 0x2ce   : > { %v2547_v28 = vadd.f32 %v4281_v23, %v2535_v62 }
 0x2d0   : > { %v2555_v61 = vadd.f32 %v2547_v28, %v1550_v47 }
 0x2d2   : > { %v2563_v8 = vmax.f32 %v2555_v61, 0.0 }
 0x2d4   : > { %2571 = vst.msk [vmem:[%s4291_s25 + $0x38] sm:$0xff] %vm534_vm0, %v2563_v8 }
 0x2d5   : > { %3302 = shalt.err (!%p3299_p8)
}
 0x2d6   : > { %s3349_s22 = smov 128   ;;  %s3350_s25 = smov 8  }
 0x2d7   : > { %3185 = dma.vmem_to_hbm [thread:$0]  (%p3439_p5), %s2586_s29, 1024, %s2588_s14, %s2573_s13, %s3349_s22, %s3349_s22, %s3350_s25  }
 0x2d8 PF: > { %p3197_p9 = scmp.ge.s32.totalorder %s3341_s12, 2  ;;  %s2602_s28 = sand.u32 1, %s3329_s30  }
 0x2d9   : > { %s2603_s17 = scalar_lea.sflag [#allocation5], %s2602_s28 }
 0x2da   : > { %p3192_p10 = pnand %p3197_p9, %p3443_p6 }
 0x2dc   : > { %p3193_p11 = pneg %p3192_p10 }
 0x2de   : > { %3324 = dma.done.wait (%p3193_p11), %s2603_s17, 1024  }
 0x2df   : > { %3326 = vsyncadd (%p3193_p11), %s2603_s17, 4294966272  ;;  %p20_p12 = scmp.ge.s32.totalorder %s3426_s15, 4   ;;  %s4402_s30 = smov %s3333_s10 }
 0x2e0   : > { %s4403_s10 = smov %s3337_s11  ;;  %s4404_s11 = smov %s3437_s18 }
 0x2e1   : > { %s4405_s12 = smov %s3426_s15  ;;  %22 = sbr.rel (!%p20_p12) target bundleno = 4 (0x4), region = 112 }
 0x2e6   :  { %2609 = vsyncpa [#allocation4], 1 }
 0x2e7   :  { %2611 = vsyncpa [#allocation4 + $0x1], 1 }
 0x2e8   :  { %2612 = vsyncpa [#allocation5], 1 }
 0x2e9   :  { %2614 = vsyncpa [#allocation5 + $0x1], 1 }

</bundles_post_ra>
